<compile_context>
chip_gen: v7x
topology: tpu7x:2x2x1
jax: 0.10.0
libtpu: 0.0.40
codegen_flags: <defaults>
</compile_context>

<pallas_src>
import jax
import jax.numpy as jnp
from jax.experimental import pallas as pl
from jax.experimental.pallas import tpu as pltpu


# ----------------------------- padded-slab geometry -----------------------------
def _round_up(x, m):
    return (x + m - 1) // m * m


def _geometry(H, W):
    """Channel-major slab: pixel (h, w) lives at lane A + h*Wp + w of a (C, P) slab.

    Every lane a 3x3 tap can touch outside the interior is zero.  Wp is 8-aligned and
    A is 128-aligned so interior stores are lane-dense/aligned.
    """
    Wp = _round_up(W + 2, 8)                  # padded row width (>= W+2 junk columns)
    A = _round_up(Wp + 1, 128)                # interior start (>= Wp+1 so taps stay in-bounds)
    HW = H * Wp                               # lanes produced per image (incl. junk cols)
    P = _round_up(A + HW + Wp + 2, 128)       # total slab lanes (covers max tap read)
    base = A - Wp - 1                         # tap (dh, dw) reads lanes [base+dh*Wp+dw, +HW)
    return Wp, A, HW, P, base


# ----------------------------- fused whole-network kernel -----------------------------
def _make_fused_kernel(H, W, in_nc, nc, out_nc, nb):
    Wp, A, HW, P, base = _geometry(H, W)

    def tap_slice(src, dh, dw):
        off = base + dh * Wp + dw
        return src[:, off:off + HW]            # works for both values and VMEM refs

    def conv3x3(src, w, cin, b=None):
        """src: (cin, P) zero-padded slab; w: (cout, 9*cin) bf16, K ordered (dh, dw, cin).
        Returns (cout, HW) f32 accumulator.  Taps contracted in at most 3 dots."""
        if 9 * cin <= 128:
            tap_groups = [list(range(9))]      # tiny K (head conv): single dot
        else:
            tap_groups = [[dh * 3 + dw for dw in range(3)] for dh in range(3)]
        acc = None
        for taps in tap_groups:
            col = jnp.concatenate(
                [tap_slice(src, k // 3, k % 3) for k in taps], axis=0)  # (len*cin, HW) bf16
            wk = w[:, taps[0] * cin:(taps[-1] + 1) * cin]               # (cout, len*cin) bf16
            part = jnp.dot(wk, col, preferred_element_type=jnp.float32)
            acc = part if acc is None else acc + part
        if b is not None:
            acc = acc + b                       # (cout, 1) f32, lane-broadcast
        return acc

    def kernel(x_ref, hw_ref, hb_ref, w1_ref, b1_ref, w2_ref, b2_ref, tw_ref,
               o_ref, h_ref, act_ref):
        # Interior-column mask (True = real pixel, False = junk pad column).
        # Load-bearing: junk columns MUST be zero before feeding the next conv.
        lane = jax.lax.broadcasted_iota(jnp.int32, (1, HW), 1)
        mask = (lane % Wp) < W

        # Keep the zero pad ring of the bf16 operand slab intact (scratch persists).
        act_ref[...] = jnp.zeros_like(act_ref)

        # ---- head: Conv3x3(+bias); residual stream kept in f32 VMEM ----
        x = x_ref[0]                                                   # (in_nc, P) bf16
        h = conv3x3(x, hw_ref[...], in_nc, hb_ref[...])                # (nc, HW) f32
        h_ref[...] = jnp.where(mask, h, 0.0)

        # ---- body: nb x (ReLU->Conv(+b)->ReLU->Conv(+b), residual add), all in VMEM ----
        def block(i, carry):
            act_ref[:, A:A + HW] = jnp.maximum(h_ref[...], 0.0).astype(jnp.bfloat16)
            t = conv3x3(act_ref, w1_ref[i], nc, b1_ref[i])             # (nc, HW) f32
            act_ref[:, A:A + HW] = jnp.where(
                mask, jnp.maximum(t, 0.0), 0.0).astype(jnp.bfloat16)
            r = conv3x3(act_ref, w2_ref[i], nc, b2_ref[i])             # (nc, HW) f32
            h_ref[...] = h_ref[...] + jnp.where(mask, r, 0.0)          # residual in f32
            return carry

        jax.lax.fori_loop(0, nb, block, 0)

        # ---- tail: Conv3x3 (no bias) ----
        act_ref[:, A:A + HW] = h_ref[...].astype(jnp.bfloat16)
        o_ref[0] = conv3x3(act_ref, tw_ref[...], nc, None)             # (out_nc, HW) f32

    return kernel


# ----------------------------- pallas_call wrapper -----------------------------
def frame_reconstruction_pallas(x_nchw, packed):
    """Forward of FrameReconstruction. x_nchw: (N, in_nc, H, W) -> (N, out_nc, H, W)."""
    N, in_nc, H, W = x_nchw.shape
    nc = packed["head_w"].shape[0]
    nb = packed["body_w1"].shape[0]
    out_nc = packed["tail_w"].shape[0]
    Wp, A, HW, P, _ = _geometry(H, W)

    # NCHW is already channel-major: pad W -> Wp, flatten (H, Wp) -> HW, pad to the slab.
    xw = jnp.pad(x_nchw, ((0, 0), (0, 0), (0, 0), (0, Wp - W)))
    x_slab = jnp.pad(xw.reshape(N, in_nc, HW),
                     ((0, 0), (0, 0), (A, P - A - HW))).astype(jnp.bfloat16)

    kernel = _make_fused_kernel(H, W, in_nc, nc, out_nc, nb)

    weight_bytes = sum(int(v.size) * v.dtype.itemsize for v in packed.values())
    flops = 2 * N * HW * (9 * in_nc * nc + nb * 2 * 9 * nc * nc + 9 * nc * out_nc)
    bytes_accessed = int(x_slab.size) * 2 + N * out_nc * HW * 4 + weight_bytes

    # Explicit VMEM budget: double-buffered in/out blocks + resident weights + scratch
    # slabs + transient per-group im2col buffers (estimate), clamped to a safe range.
    est = (2 * in_nc * P * 2 + 2 * out_nc * HW * 4 + weight_bytes
           + nc * P * 2 + nc * HW * 4 + 4 * 3 * nc * HW * 2)
    vmem_limit = int(min(100 << 20, max(32 << 20, est)))

    y = pl.pallas_call(
        kernel,
        out_shape=jax.ShapeDtypeStruct((N, out_nc, HW), jnp.float32),
        grid=(N,),
        in_specs=[
            pl.BlockSpec((1, in_nc, P), lambda n: (n, 0, 0)),
            pl.BlockSpec(packed["head_w"].shape, lambda n: (0, 0)),
            pl.BlockSpec(packed["head_b"].shape, lambda n: (0, 0)),
            pl.BlockSpec(packed["body_w1"].shape, lambda n: (0, 0, 0)),
            pl.BlockSpec(packed["body_b1"].shape, lambda n: (0, 0, 0)),
            pl.BlockSpec(packed["body_w2"].shape, lambda n: (0, 0, 0)),
            pl.BlockSpec(packed["body_b2"].shape, lambda n: (0, 0, 0)),
            pl.BlockSpec(packed["tail_w"].shape, lambda n: (0, 0)),
        ],
        out_specs=pl.BlockSpec((1, out_nc, HW), lambda n: (n, 0, 0)),
        scratch_shapes=[
            pltpu.VMEM((nc, HW), jnp.float32),     # residual stream h (f32, interior only)
            pltpu.VMEM((nc, P), jnp.bfloat16),     # bf16 MXU operand slab (zero pad ring)
        ],
        compiler_params=pltpu.CompilerParams(
            dimension_semantics=("parallel",),
            vmem_limit_bytes=vmem_limit),
        cost_estimate=pl.CostEstimate(flops=flops, transcendentals=0,
                                      bytes_accessed=bytes_accessed),
    )(x_slab, packed["head_w"], packed["head_b"],
      packed["body_w1"], packed["body_b1"], packed["body_w2"], packed["body_b2"],
      packed["tail_w"])

    return y.reshape(N, out_nc, H, Wp)[:, :, :, :W]


# ---------------- parameter packing (done once, outside the per-forward trace) ----------
def _pack_w(w_oihw):
    # (Cout, Cin, 3, 3) -> (Cout, 3, 3, Cin) -> (Cout, 9*Cin), K ordered (dh, dw, cin); bf16.
    cout, cin = w_oihw.shape[0], w_oihw.shape[1]
    return jnp.transpose(w_oihw, (0, 2, 3, 1)).reshape(cout, 9 * cin).astype(jnp.bfloat16)


def prepare_params(params):
    body = params["body"]
    assert len(body) >= 1
    return {
        "head_w": _pack_w(params["head_w"]),
        "head_b": params["head_b"].reshape(-1, 1).astype(jnp.float32),
        "body_w1": jnp.stack([_pack_w(b["w1"]) for b in body]),
        "body_b1": jnp.stack([b["b1"].reshape(-1, 1).astype(jnp.float32) for b in body]),
        "body_w2": jnp.stack([_pack_w(b["w2"]) for b in body]),
        "body_b2": jnp.stack([b["b2"].reshape(-1, 1).astype(jnp.float32) for b in body]),
        "tail_w": _pack_w(params["tail_w"]),
    }


# ---------------- deterministic parameter init (PyTorch OIHW shapes) ----------------
def init_params(key, in_nc, out_nc, nb, nc, scale=0.1):
    params = {}
    key, k1, k2 = jax.random.split(key, 3)
    params["head_w"] = jax.random.normal(k1, (nc, in_nc, 3, 3), jnp.float32) * scale
    params["head_b"] = jax.random.normal(k2, (nc,), jnp.float32) * scale
    body = []
    for _ in range(nb):
        key, k1, k2, k3, k4 = jax.random.split(key, 5)
        body.append(dict(
            w1=jax.random.normal(k1, (nc, nc, 3, 3), jnp.float32) * scale,
            b1=jax.random.normal(k2, (nc,), jnp.float32) * scale,
            w2=jax.random.normal(k3, (nc, nc, 3, 3), jnp.float32) * scale,
            b2=jax.random.normal(k4, (nc,), jnp.float32) * scale,
        ))
    params["body"] = body
    key, k1 = jax.random.split(key)
    params["tail_w"] = jax.random.normal(k1, (out_nc, nc, 3, 3), jnp.float32) * scale
    return params


# ---------------- pure-JAX reference (lax.conv) for correctness check ----------------
def _conv_ref(x_nhwc, w_oihw, b=None):
    w_hwio = jnp.transpose(w_oihw, (2, 3, 1, 0))
    y = jax.lax.conv_general_dilated(
        x_nhwc, w_hwio, window_strides=(1, 1), padding=((1, 1), (1, 1)),
        dimension_numbers=("NHWC", "HWIO", "NHWC"))
    if b is not None:
        y = y + b
    return y


def frame_reconstruction_ref(x_nchw, params):
    x = jnp.transpose(x_nchw, (0, 2, 3, 1))
    h = _conv_ref(x, params["head_w"], params["head_b"])
    for blk in params["body"]:
        t = _conv_ref(jax.nn.relu(h), blk["w1"], blk["b1"])
        h = h + _conv_ref(jax.nn.relu(t), blk["w2"], blk["b2"])
    y = _conv_ref(h, params["tail_w"], None)
    return jnp.transpose(y, (0, 3, 1, 2))


if __name__ == "__main__":
    key = jax.random.PRNGKey(0)
    kx, kp = jax.random.split(key)

    # small config consistent with the module (defaults: in_nc=3, out_nc=3, nb=20, nc=32)
    N, in_nc, H, W = 2, 3, 16, 16
    out_nc, nb, nc = 3, 2, 16

    feat_agg = jax.random.normal(kx, (N, in_nc, H, W), jnp.float32)   # NCHW like PyTorch
    params = init_params(kp, in_nc, out_nc, nb, nc)
    packed = prepare_params(params)                                   # once, outside jit

    fwd = jax.jit(frame_reconstruction_pallas)
    y = fwd(feat_agg, packed)
    y = jax.block_until_ready(y)

    y_ref = frame_reconstruction_ref(feat_agg, params)
    assert y.shape == (N, out_nc, H, W), y.shape
    if not jnp.allclose(y, y_ref, atol=2e-2, rtol=2e-2):
        err = float(jnp.max(jnp.abs(y - y_ref)))
        raise AssertionError(f"Pallas output does not match reference conv (max err {err})")

    print("KERNEL_OK")
</pallas_src>

<mosaic_0001>
module attributes {stable_mosaic.version = 11 : i64} {
  func.func @kernel(%arg0: i32, %arg1: memref<1x3x640xbf16, #tpu.memory_space<vmem>>, %arg2: memref<16x27xbf16, #tpu.memory_space<vmem>>, %arg3: memref<16x1xf32, #tpu.memory_space<vmem>>, %arg4: memref<2x16x144xbf16, #tpu.memory_space<vmem>>, %arg5: memref<2x16x1xf32, #tpu.memory_space<vmem>>, %arg6: memref<2x16x144xbf16, #tpu.memory_space<vmem>>, %arg7: memref<2x16x1xf32, #tpu.memory_space<vmem>>, %arg8: memref<3x144xbf16, #tpu.memory_space<vmem>>, %arg9: memref<1x3x384xf32, #tpu.memory_space<vmem>>, %arg10: memref<16x384xf32, #tpu.memory_space<vmem>>, %arg11: memref<16x640xbf16, #tpu.memory_space<vmem>>) attributes {dimension_semantics = [#tpu.dimension_semantics<parallel>], iteration_bounds = array<i64: 2>, scalar_prefetch = 0 : i64, scratch_operands = 2 : i64, tpu.core_type = #tpu.core_type<tc>, window_params = [{transform_indices = @transform_0, window_bounds = array<i64: 1, 3, 640>}, {pipeline_mode = #tpu.pipeline_mode<synchronous>, transform_indices = @transform_1, window_bounds = array<i64: 16, 27>}, {pipeline_mode = #tpu.pipeline_mode<synchronous>, transform_indices = @transform_2, window_bounds = array<i64: 16, 1>}, {pipeline_mode = #tpu.pipeline_mode<synchronous>, transform_indices = @transform_3, window_bounds = array<i64: 2, 16, 144>}, {pipeline_mode = #tpu.pipeline_mode<synchronous>, transform_indices = @transform_4, window_bounds = array<i64: 2, 16, 1>}, {pipeline_mode = #tpu.pipeline_mode<synchronous>, transform_indices = @transform_5, window_bounds = array<i64: 2, 16, 144>}, {pipeline_mode = #tpu.pipeline_mode<synchronous>, transform_indices = @transform_6, window_bounds = array<i64: 2, 16, 1>}, {pipeline_mode = #tpu.pipeline_mode<synchronous>, transform_indices = @transform_7, window_bounds = array<i64: 3, 144>}, {transform_indices = @transform_8, window_bounds = array<i64: 1, 3, 384>}]} {
    %0 = tpu.iota {dimensions = array<i32: 1>} : vector<1x384xi32>
    %c24_i32 = arith.constant 24 : i32
    %c0_i32 = arith.constant 0 : i32
    %1 = arith.cmpi eq, %c24_i32, %c0_i32 : i32
    %c1_i32 = arith.constant 1 : i32
    %2 = arith.select %1, %c1_i32, %c24_i32 : i32
    %3 = vector.broadcast %2 : i32 to vector<1x384xi32>
    %4 = arith.remsi %0, %3 : vector<1x384xi32>
    %c0_i32_0 = arith.constant 0 : i32
    %5 = vector.broadcast %c0_i32_0 : i32 to vector<1x384xi32>
    %6 = arith.cmpi ne, %4, %5 : vector<1x384xi32>
    %c0_i32_1 = arith.constant 0 : i32
    %7 = vector.broadcast %c0_i32_1 : i32 to vector<1x384xi32>
    %8 = arith.cmpi slt, %4, %7 : vector<1x384xi32>
    %c0_i32_2 = arith.constant 0 : i32
    %9 = arith.cmpi slt, %2, %c0_i32_2 : i32
    %10 = vector.broadcast %9 : i1 to vector<1x384xi1>
    %11 = vector.broadcast %10 : vector<1x384xi1> to vector<1x384xi1>
    %12 = arith.xori %8, %11 : vector<1x384xi1>
    %13 = arith.andi %12, %6 : vector<1x384xi1>
    %14 = vector.broadcast %2 : i32 to vector<1x384xi32>
    %15 = arith.addi %4, %14 : vector<1x384xi32>
    %16 = arith.select %13, %15, %4 : vector<1x384xi1>, vector<1x384xi32>
    %c16_i32 = arith.constant 16 : i32
    %17 = vector.broadcast %c16_i32 : i32 to vector<1x384xi32>
    %18 = arith.cmpi slt, %16, %17 : vector<1x384xi32>
    %cst = arith.constant 0.000000e+00 : bf16
    %19 = vector.broadcast %cst : bf16 to vector<16x640xbf16>
    %c0 = arith.constant 0 : index
    %c0_3 = arith.constant 0 : index
    %20 = vector.load %arg11[%c0, %c0_3] : memref<16x640xbf16, #tpu.memory_space<vmem>>, vector<16x640xbf16>
    tpu.vector_store %arg11[%c0, %c0_3], %19 {strides = array<i32>} : memref<16x640xbf16, #tpu.memory_space<vmem>>, vector<16x640xbf16>,
    %c0_4 = arith.constant 0 : index
    %c0_5 = arith.constant 0 : index
    %c0_6 = arith.constant 0 : index
    %21 = vector.load %arg1[%c0_4, %c0_5, %c0_6] : memref<1x3x640xbf16, #tpu.memory_space<vmem>>, vector<1x3x640xbf16>
    %22 = vector.shape_cast %21 : vector<1x3x640xbf16> to vector<3x640xbf16>
    %c0_7 = arith.constant 0 : index
    %c0_8 = arith.constant 0 : index
    %23 = vector.load %arg2[%c0_7, %c0_8] : memref<16x27xbf16, #tpu.memory_space<vmem>>, vector<16x27xbf16>
    %c0_9 = arith.constant 0 : index
    %c0_10 = arith.constant 0 : index
    %24 = vector.load %arg3[%c0_9, %c0_10] : memref<16x1xf32, #tpu.memory_space<vmem>>, vector<16x1xf32>
    %25 = vector.extract_strided_slice %22 {offsets = [0, 103], sizes = [3, 384], strides = [1, 1]} : vector<3x640xbf16> to vector<3x384xbf16>
    %26 = vector.extract_strided_slice %22 {offsets = [0, 104], sizes = [3, 384], strides = [1, 1]} : vector<3x640xbf16> to vector<3x384xbf16>
    %27 = vector.extract_strided_slice %22 {offsets = [0, 105], sizes = [3, 384], strides = [1, 1]} : vector<3x640xbf16> to vector<3x384xbf16>
    %28 = vector.extract_strided_slice %22 {offsets = [0, 127], sizes = [3, 384], strides = [1, 1]} : vector<3x640xbf16> to vector<3x384xbf16>
    %29 = vector.extract_strided_slice %22 {offsets = [0, 128], sizes = [3, 384], strides = [1, 1]} : vector<3x640xbf16> to vector<3x384xbf16>
    %30 = vector.extract_strided_slice %22 {offsets = [0, 129], sizes = [3, 384], strides = [1, 1]} : vector<3x640xbf16> to vector<3x384xbf16>
    %31 = vector.extract_strided_slice %22 {offsets = [0, 151], sizes = [3, 384], strides = [1, 1]} : vector<3x640xbf16> to vector<3x384xbf16>
    %32 = vector.extract_strided_slice %22 {offsets = [0, 152], sizes = [3, 384], strides = [1, 1]} : vector<3x640xbf16> to vector<3x384xbf16>
    %33 = vector.extract_strided_slice %22 {offsets = [0, 153], sizes = [3, 384], strides = [1, 1]} : vector<3x640xbf16> to vector<3x384xbf16>
    %34 = tpu.concatenate %25, %26, %27, %28, %29, %30, %31, %32, %33 in 0 : vector<3x384xbf16>, vector<3x384xbf16>, vector<3x384xbf16>, vector<3x384xbf16>, vector<3x384xbf16>, vector<3x384xbf16>, vector<3x384xbf16>, vector<3x384xbf16>, vector<3x384xbf16> -> vector<27x384xbf16>
    %cst_11 = arith.constant dense<0.000000e+00> : vector<16x384xf32>
    %35 = tpu.matmul %23, %34, %cst_11 {dimension_numbers = #tpu.dot_dimension_numbers<[1], [0], [0], [1], [0, 0, 1, 1], [], []>} : vector<16x27xbf16>, vector<27x384xbf16>, vector<16x384xf32> -> vector<16x384xf32>
    %36 = vector.broadcast %24 : vector<16x1xf32> to vector<16x384xf32>
    %37 = arith.addf %35, %36 : vector<16x384xf32>
    %cst_12 = arith.constant 0.000000e+00 : f32
    %38 = vector.shape_cast %18 : vector<1x384xi1> to vector<1x384xi1>
    %39 = vector.broadcast %38 : vector<1x384xi1> to vector<16x384xi1>
    %40 = vector.broadcast %cst_12 : f32 to vector<16x384xf32>
    %41 = arith.select %39, %37, %40 : vector<16x384xi1>, vector<16x384xf32>
    %c0_13 = arith.constant 0 : index
    %c0_14 = arith.constant 0 : index
    %42 = vector.load %arg10[%c0_13, %c0_14] : memref<16x384xf32, #tpu.memory_space<vmem>>, vector<16x384xf32>
    tpu.vector_store %arg10[%c0_13, %c0_14], %41 {strides = array<i32>} : memref<16x384xf32, #tpu.memory_space<vmem>>, vector<16x384xf32>,
    %c0_i32_15 = arith.constant 0 : i32
    %c2_i32 = arith.constant 2 : i32
    %43 = arith.addi %c0_i32_15, %c2_i32 : i32
    %c1_i32_16 = arith.constant 1 : i32
    scf.for %arg12 = %c0_i32_15 to %43 step %c1_i32_16  : i32 {
      %c0_39 = arith.constant 0 : index
      %c0_40 = arith.constant 0 : index
      %71 = vector.load %arg10[%c0_39, %c0_40] : memref<16x384xf32, #tpu.memory_space<vmem>>, vector<16x384xf32>
      %cst_41 = arith.constant 0.000000e+00 : f32
      %72 = vector.broadcast %cst_41 : f32 to vector<16x384xf32>
      %73 = arith.maximumf %71, %72 : vector<16x384xf32>
      %74 = arith.truncf %73 : vector<16x384xf32> to vector<16x384xbf16>
      %c0_42 = arith.constant 0 : index
      %c128_43 = arith.constant 128 : index
      %75 = vector.load %arg11[%c0_42, %c128_43] : memref<16x640xbf16, #tpu.memory_space<vmem>>, vector<16x384xbf16>
      tpu.vector_store %arg11[%c0_42, %c128_43], %74 {strides = array<i32>} : memref<16x640xbf16, #tpu.memory_space<vmem>>, vector<16x384xbf16>,
      %76 = arith.index_cast %arg12 : i32 to index
      %c0_44 = arith.constant 0 : index
      %c0_45 = arith.constant 0 : index
      %77 = vector.load %arg4[%76, %c0_44, %c0_45] : memref<2x16x144xbf16, #tpu.memory_space<vmem>>, vector<1x16x144xbf16>
      %78 = vector.shape_cast %77 : vector<1x16x144xbf16> to vector<16x144xbf16>
      %79 = arith.index_cast %arg12 : i32 to index
      %c0_46 = arith.constant 0 : index
      %c0_47 = arith.constant 0 : index
      %80 = vector.load %arg5[%79, %c0_46, %c0_47] : memref<2x16x1xf32, #tpu.memory_space<vmem>>, vector<1x16x1xf32>
      %81 = vector.shape_cast %80 : vector<1x16x1xf32> to vector<16x1xf32>
      %c0_48 = arith.constant 0 : index
      %c103_49 = arith.constant 103 : index
      %82 = vector.load %arg11[%c0_48, %c103_49] : memref<16x640xbf16, #tpu.memory_space<vmem>>, vector<16x384xbf16>
      %c0_50 = arith.constant 0 : index
      %c104_51 = arith.constant 104 : index
      %83 = vector.load %arg11[%c0_50, %c104_51] : memref<16x640xbf16, #tpu.memory_space<vmem>>, vector<16x384xbf16>
      %c0_52 = arith.constant 0 : index
      %c105_53 = arith.constant 105 : index
      %84 = vector.load %arg11[%c0_52, %c105_53] : memref<16x640xbf16, #tpu.memory_space<vmem>>, vector<16x384xbf16>
      %85 = tpu.concatenate %82, %83, %84 in 0 : vector<16x384xbf16>, vector<16x384xbf16>, vector<16x384xbf16> -> vector<48x384xbf16>
      %86 = vector.extract_strided_slice %78 {offsets = [0, 0], sizes = [16, 48], strides = [1, 1]} : vector<16x144xbf16> to vector<16x48xbf16>
      %cst_54 = arith.constant dense<0.000000e+00> : vector<16x384xf32>
      %87 = tpu.matmul %86, %85, %cst_54 {dimension_numbers = #tpu.dot_dimension_numbers<[1], [0], [0], [1], [0, 0, 1, 1], [], []>} : vector<16x48xbf16>, vector<48x384xbf16>, vector<16x384xf32> -> vector<16x384xf32>
      %c0_55 = arith.constant 0 : index
      %c127_56 = arith.constant 127 : index
      %88 = vector.load %arg11[%c0_55, %c127_56] : memref<16x640xbf16, #tpu.memory_space<vmem>>, vector<16x384xbf16>
      %c0_57 = arith.constant 0 : index
      %c128_58 = arith.constant 128 : index
      %89 = vector.load %arg11[%c0_57, %c128_58] : memref<16x640xbf16, #tpu.memory_space<vmem>>, vector<16x384xbf16>
      %c0_59 = arith.constant 0 : index
      %c129_60 = arith.constant 129 : index
      %90 = vector.load %arg11[%c0_59, %c129_60] : memref<16x640xbf16, #tpu.memory_space<vmem>>, vector<16x384xbf16>
      %91 = tpu.concatenate %88, %89, %90 in 0 : vector<16x384xbf16>, vector<16x384xbf16>, vector<16x384xbf16> -> vector<48x384xbf16>
      %92 = vector.extract_strided_slice %78 {offsets = [0, 48], sizes = [16, 48], strides = [1, 1]} : vector<16x144xbf16> to vector<16x48xbf16>
      %cst_61 = arith.constant dense<0.000000e+00> : vector<16x384xf32>
      %93 = tpu.matmul %92, %91, %cst_61 {dimension_numbers = #tpu.dot_dimension_numbers<[1], [0], [0], [1], [0, 0, 1, 1], [], []>} : vector<16x48xbf16>, vector<48x384xbf16>, vector<16x384xf32> -> vector<16x384xf32>
      %94 = arith.addf %87, %93 : vector<16x384xf32>
      %c0_62 = arith.constant 0 : index
      %c151_63 = arith.constant 151 : index
      %95 = vector.load %arg11[%c0_62, %c151_63] : memref<16x640xbf16, #tpu.memory_space<vmem>>, vector<16x384xbf16>
      %c0_64 = arith.constant 0 : index
      %c152_65 = arith.constant 152 : index
      %96 = vector.load %arg11[%c0_64, %c152_65] : memref<16x640xbf16, #tpu.memory_space<vmem>>, vector<16x384xbf16>
      %c0_66 = arith.constant 0 : index
      %c153_67 = arith.constant 153 : index
      %97 = vector.load %arg11[%c0_66, %c153_67] : memref<16x640xbf16, #tpu.memory_space<vmem>>, vector<16x384xbf16>
      %98 = tpu.concatenate %95, %96, %97 in 0 : vector<16x384xbf16>, vector<16x384xbf16>, vector<16x384xbf16> -> vector<48x384xbf16>
      %99 = vector.extract_strided_slice %78 {offsets = [0, 96], sizes = [16, 48], strides = [1, 1]} : vector<16x144xbf16> to vector<16x48xbf16>
      %cst_68 = arith.constant dense<0.000000e+00> : vector<16x384xf32>
      %100 = tpu.matmul %99, %98, %cst_68 {dimension_numbers = #tpu.dot_dimension_numbers<[1], [0], [0], [1], [0, 0, 1, 1], [], []>} : vector<16x48xbf16>, vector<48x384xbf16>, vector<16x384xf32> -> vector<16x384xf32>
      %101 = arith.addf %94, %100 : vector<16x384xf32>
      %102 = vector.broadcast %81 : vector<16x1xf32> to vector<16x384xf32>
      %103 = arith.addf %101, %102 : vector<16x384xf32>
      %cst_69 = arith.constant 0.000000e+00 : f32
      %104 = vector.broadcast %cst_69 : f32 to vector<16x384xf32>
      %105 = arith.maximumf %103, %104 : vector<16x384xf32>
      %cst_70 = arith.constant 0.000000e+00 : f32
      %106 = vector.shape_cast %18 : vector<1x384xi1> to vector<1x384xi1>
      %107 = vector.broadcast %106 : vector<1x384xi1> to vector<16x384xi1>
      %108 = vector.broadcast %cst_70 : f32 to vector<16x384xf32>
      %109 = arith.select %107, %105, %108 : vector<16x384xi1>, vector<16x384xf32>
      %110 = arith.truncf %109 : vector<16x384xf32> to vector<16x384xbf16>
      %c0_71 = arith.constant 0 : index
      %c128_72 = arith.constant 128 : index
      %111 = vector.load %arg11[%c0_71, %c128_72] : memref<16x640xbf16, #tpu.memory_space<vmem>>, vector<16x384xbf16>
      tpu.vector_store %arg11[%c0_71, %c128_72], %110 {strides = array<i32>} : memref<16x640xbf16, #tpu.memory_space<vmem>>, vector<16x384xbf16>,
      %112 = arith.index_cast %arg12 : i32 to index
      %c0_73 = arith.constant 0 : index
      %c0_74 = arith.constant 0 : index
      %113 = vector.load %arg6[%112, %c0_73, %c0_74] : memref<2x16x144xbf16, #tpu.memory_space<vmem>>, vector<1x16x144xbf16>
      %114 = vector.shape_cast %113 : vector<1x16x144xbf16> to vector<16x144xbf16>
      %115 = arith.index_cast %arg12 : i32 to index
      %c0_75 = arith.constant 0 : index
      %c0_76 = arith.constant 0 : index
      %116 = vector.load %arg7[%115, %c0_75, %c0_76] : memref<2x16x1xf32, #tpu.memory_space<vmem>>, vector<1x16x1xf32>
      %117 = vector.shape_cast %116 : vector<1x16x1xf32> to vector<16x1xf32>
      %c0_77 = arith.constant 0 : index
      %c103_78 = arith.constant 103 : index
      %118 = vector.load %arg11[%c0_77, %c103_78] : memref<16x640xbf16, #tpu.memory_space<vmem>>, vector<16x384xbf16>
      %c0_79 = arith.constant 0 : index
      %c104_80 = arith.constant 104 : index
      %119 = vector.load %arg11[%c0_79, %c104_80] : memref<16x640xbf16, #tpu.memory_space<vmem>>, vector<16x384xbf16>
      %c0_81 = arith.constant 0 : index
      %c105_82 = arith.constant 105 : index
      %120 = vector.load %arg11[%c0_81, %c105_82] : memref<16x640xbf16, #tpu.memory_space<vmem>>, vector<16x384xbf16>
      %121 = tpu.concatenate %118, %119, %120 in 0 : vector<16x384xbf16>, vector<16x384xbf16>, vector<16x384xbf16> -> vector<48x384xbf16>
      %122 = vector.extract_strided_slice %114 {offsets = [0, 0], sizes = [16, 48], strides = [1, 1]} : vector<16x144xbf16> to vector<16x48xbf16>
      %cst_83 = arith.constant dense<0.000000e+00> : vector<16x384xf32>
      %123 = tpu.matmul %122, %121, %cst_83 {dimension_numbers = #tpu.dot_dimension_numbers<[1], [0], [0], [1], [0, 0, 1, 1], [], []>} : vector<16x48xbf16>, vector<48x384xbf16>, vector<16x384xf32> -> vector<16x384xf32>
      %c0_84 = arith.constant 0 : index
      %c127_85 = arith.constant 127 : index
      %124 = vector.load %arg11[%c0_84, %c127_85] : memref<16x640xbf16, #tpu.memory_space<vmem>>, vector<16x384xbf16>
      %c0_86 = arith.constant 0 : index
      %c128_87 = arith.constant 128 : index
      %125 = vector.load %arg11[%c0_86, %c128_87] : memref<16x640xbf16, #tpu.memory_space<vmem>>, vector<16x384xbf16>
      %c0_88 = arith.constant 0 : index
      %c129_89 = arith.constant 129 : index
      %126 = vector.load %arg11[%c0_88, %c129_89] : memref<16x640xbf16, #tpu.memory_space<vmem>>, vector<16x384xbf16>
      %127 = tpu.concatenate %124, %125, %126 in 0 : vector<16x384xbf16>, vector<16x384xbf16>, vector<16x384xbf16> -> vector<48x384xbf16>
      %128 = vector.extract_strided_slice %114 {offsets = [0, 48], sizes = [16, 48], strides = [1, 1]} : vector<16x144xbf16> to vector<16x48xbf16>
      %cst_90 = arith.constant dense<0.000000e+00> : vector<16x384xf32>
      %129 = tpu.matmul %128, %127, %cst_90 {dimension_numbers = #tpu.dot_dimension_numbers<[1], [0], [0], [1], [0, 0, 1, 1], [], []>} : vector<16x48xbf16>, vector<48x384xbf16>, vector<16x384xf32> -> vector<16x384xf32>
      %130 = arith.addf %123, %129 : vector<16x384xf32>
      %c0_91 = arith.constant 0 : index
      %c151_92 = arith.constant 151 : index
      %131 = vector.load %arg11[%c0_91, %c151_92] : memref<16x640xbf16, #tpu.memory_space<vmem>>, vector<16x384xbf16>
      %c0_93 = arith.constant 0 : index
      %c152_94 = arith.constant 152 : index
      %132 = vector.load %arg11[%c0_93, %c152_94] : memref<16x640xbf16, #tpu.memory_space<vmem>>, vector<16x384xbf16>
      %c0_95 = arith.constant 0 : index
      %c153_96 = arith.constant 153 : index
      %133 = vector.load %arg11[%c0_95, %c153_96] : memref<16x640xbf16, #tpu.memory_space<vmem>>, vector<16x384xbf16>
      %134 = tpu.concatenate %131, %132, %133 in 0 : vector<16x384xbf16>, vector<16x384xbf16>, vector<16x384xbf16> -> vector<48x384xbf16>
      %135 = vector.extract_strided_slice %114 {offsets = [0, 96], sizes = [16, 48], strides = [1, 1]} : vector<16x144xbf16> to vector<16x48xbf16>
      %cst_97 = arith.constant dense<0.000000e+00> : vector<16x384xf32>
      %136 = tpu.matmul %135, %134, %cst_97 {dimension_numbers = #tpu.dot_dimension_numbers<[1], [0], [0], [1], [0, 0, 1, 1], [], []>} : vector<16x48xbf16>, vector<48x384xbf16>, vector<16x384xf32> -> vector<16x384xf32>
      %137 = arith.addf %130, %136 : vector<16x384xf32>
      %138 = vector.broadcast %117 : vector<16x1xf32> to vector<16x384xf32>
      %139 = arith.addf %137, %138 : vector<16x384xf32>
      %c0_98 = arith.constant 0 : index
      %c0_99 = arith.constant 0 : index
      %140 = vector.load %arg10[%c0_98, %c0_99] : memref<16x384xf32, #tpu.memory_space<vmem>>, vector<16x384xf32>
      %cst_100 = arith.constant 0.000000e+00 : f32
      %141 = vector.shape_cast %18 : vector<1x384xi1> to vector<1x384xi1>
      %142 = vector.broadcast %141 : vector<1x384xi1> to vector<16x384xi1>
      %143 = vector.broadcast %cst_100 : f32 to vector<16x384xf32>
      %144 = arith.select %142, %139, %143 : vector<16x384xi1>, vector<16x384xf32>
      %145 = arith.addf %140, %144 : vector<16x384xf32>
      %c0_101 = arith.constant 0 : index
      %c0_102 = arith.constant 0 : index
      %146 = vector.load %arg10[%c0_101, %c0_102] : memref<16x384xf32, #tpu.memory_space<vmem>>, vector<16x384xf32>
      tpu.vector_store %arg10[%c0_101, %c0_102], %145 {strides = array<i32>} : memref<16x384xf32, #tpu.memory_space<vmem>>, vector<16x384xf32>,
    }
    %c2_i32_17 = arith.constant 2 : i32
    %c0_18 = arith.constant 0 : index
    %c0_19 = arith.constant 0 : index
    %44 = vector.load %arg10[%c0_18, %c0_19] : memref<16x384xf32, #tpu.memory_space<vmem>>, vector<16x384xf32>
    %45 = arith.truncf %44 : vector<16x384xf32> to vector<16x384xbf16>
    %c0_20 = arith.constant 0 : index
    %c128 = arith.constant 128 : index
    %46 = vector.load %arg11[%c0_20, %c128] : memref<16x640xbf16, #tpu.memory_space<vmem>>, vector<16x384xbf16>
    tpu.vector_store %arg11[%c0_20, %c128], %45 {strides = array<i32>} : memref<16x640xbf16, #tpu.memory_space<vmem>>, vector<16x384xbf16>,
    %c0_21 = arith.constant 0 : index
    %c0_22 = arith.constant 0 : index
    %47 = vector.load %arg8[%c0_21, %c0_22] : memref<3x144xbf16, #tpu.memory_space<vmem>>, vector<3x144xbf16>
    %c0_23 = arith.constant 0 : index
    %c103 = arith.constant 103 : index
    %48 = vector.load %arg11[%c0_23, %c103] : memref<16x640xbf16, #tpu.memory_space<vmem>>, vector<16x384xbf16>
    %c0_24 = arith.constant 0 : index
    %c104 = arith.constant 104 : index
    %49 = vector.load %arg11[%c0_24, %c104] : memref<16x640xbf16, #tpu.memory_space<vmem>>, vector<16x384xbf16>
    %c0_25 = arith.constant 0 : index
    %c105 = arith.constant 105 : index
    %50 = vector.load %arg11[%c0_25, %c105] : memref<16x640xbf16, #tpu.memory_space<vmem>>, vector<16x384xbf16>
    %51 = tpu.concatenate %48, %49, %50 in 0 : vector<16x384xbf16>, vector<16x384xbf16>, vector<16x384xbf16> -> vector<48x384xbf16>
    %52 = vector.extract_strided_slice %47 {offsets = [0, 0], sizes = [3, 48], strides = [1, 1]} : vector<3x144xbf16> to vector<3x48xbf16>
    %cst_26 = arith.constant dense<0.000000e+00> : vector<3x384xf32>
    %53 = tpu.matmul %52, %51, %cst_26 {dimension_numbers = #tpu.dot_dimension_numbers<[1], [0], [0], [1], [0, 0, 1, 1], [], []>} : vector<3x48xbf16>, vector<48x384xbf16>, vector<3x384xf32> -> vector<3x384xf32>
    %c0_27 = arith.constant 0 : index
    %c127 = arith.constant 127 : index
    %54 = vector.load %arg11[%c0_27, %c127] : memref<16x640xbf16, #tpu.memory_space<vmem>>, vector<16x384xbf16>
    %c0_28 = arith.constant 0 : index
    %c128_29 = arith.constant 128 : index
    %55 = vector.load %arg11[%c0_28, %c128_29] : memref<16x640xbf16, #tpu.memory_space<vmem>>, vector<16x384xbf16>
    %c0_30 = arith.constant 0 : index
    %c129 = arith.constant 129 : index
    %56 = vector.load %arg11[%c0_30, %c129] : memref<16x640xbf16, #tpu.memory_space<vmem>>, vector<16x384xbf16>
    %57 = tpu.concatenate %54, %55, %56 in 0 : vector<16x384xbf16>, vector<16x384xbf16>, vector<16x384xbf16> -> vector<48x384xbf16>
    %58 = vector.extract_strided_slice %47 {offsets = [0, 48], sizes = [3, 48], strides = [1, 1]} : vector<3x144xbf16> to vector<3x48xbf16>
    %cst_31 = arith.constant dense<0.000000e+00> : vector<3x384xf32>
    %59 = tpu.matmul %58, %57, %cst_31 {dimension_numbers = #tpu.dot_dimension_numbers<[1], [0], [0], [1], [0, 0, 1, 1], [], []>} : vector<3x48xbf16>, vector<48x384xbf16>, vector<3x384xf32> -> vector<3x384xf32>
    %60 = arith.addf %53, %59 : vector<3x384xf32>
    %c0_32 = arith.constant 0 : index
    %c151 = arith.constant 151 : index
    %61 = vector.load %arg11[%c0_32, %c151] : memref<16x640xbf16, #tpu.memory_space<vmem>>, vector<16x384xbf16>
    %c0_33 = arith.constant 0 : index
    %c152 = arith.constant 152 : index
    %62 = vector.load %arg11[%c0_33, %c152] : memref<16x640xbf16, #tpu.memory_space<vmem>>, vector<16x384xbf16>
    %c0_34 = arith.constant 0 : index
    %c153 = arith.constant 153 : index
    %63 = vector.load %arg11[%c0_34, %c153] : memref<16x640xbf16, #tpu.memory_space<vmem>>, vector<16x384xbf16>
    %64 = tpu.concatenate %61, %62, %63 in 0 : vector<16x384xbf16>, vector<16x384xbf16>, vector<16x384xbf16> -> vector<48x384xbf16>
    %65 = vector.extract_strided_slice %47 {offsets = [0, 96], sizes = [3, 48], strides = [1, 1]} : vector<3x144xbf16> to vector<3x48xbf16>
    %cst_35 = arith.constant dense<0.000000e+00> : vector<3x384xf32>
    %66 = tpu.matmul %65, %64, %cst_35 {dimension_numbers = #tpu.dot_dimension_numbers<[1], [0], [0], [1], [0, 0, 1, 1], [], []>} : vector<3x48xbf16>, vector<48x384xbf16>, vector<3x384xf32> -> vector<3x384xf32>
    %67 = arith.addf %60, %66 : vector<3x384xf32>
    %c0_36 = arith.constant 0 : index
    %c0_37 = arith.constant 0 : index
    %c0_38 = arith.constant 0 : index
    %68 = vector.load %arg9[%c0_36, %c0_37, %c0_38] : memref<1x3x384xf32, #tpu.memory_space<vmem>>, vector<1x3x384xf32>
    %69 = vector.shape_cast %68 : vector<1x3x384xf32> to vector<3x384xf32>
    %70 = vector.shape_cast %67 : vector<3x384xf32> to vector<1x3x384xf32>
    tpu.vector_store %arg9[%c0_36, %c0_37, %c0_38], %70 {strides = array<i32>} : memref<1x3x384xf32, #tpu.memory_space<vmem>>, vector<1x3x384xf32>,
    return
  }
  func.func @transform_0(%arg0: i32) -> (i32, i32, i32) {
    %c0_i32 = arith.constant 0 : i32
    %c0_i32_0 = arith.constant 0 : i32
    %c0_i32_1 = arith.constant 0 : i32
    return %arg0, %c0_i32, %c0_i32_0 : i32, i32, i32
  }
  func.func @transform_1(%arg0: i32) -> (i32, i32) {
    %c0_i32 = arith.constant 0 : i32
    %c0_i32_0 = arith.constant 0 : i32
    %c0_i32_1 = arith.constant 0 : i32
    return %c0_i32, %c0_i32_0 : i32, i32
  }
  func.func @transform_2(%arg0: i32) -> (i32, i32) {
    %c0_i32 = arith.constant 0 : i32
    %c0_i32_0 = arith.constant 0 : i32
    %c0_i32_1 = arith.constant 0 : i32
    return %c0_i32, %c0_i32_0 : i32, i32
  }
  func.func @transform_3(%arg0: i32) -> (i32, i32, i32) {
    %c0_i32 = arith.constant 0 : i32
    %c0_i32_0 = arith.constant 0 : i32
    %c0_i32_1 = arith.constant 0 : i32
    %c0_i32_2 = arith.constant 0 : i32
    return %c0_i32, %c0_i32_0, %c0_i32_1 : i32, i32, i32
  }
  func.func @transform_4(%arg0: i32) -> (i32, i32, i32) {
    %c0_i32 = arith.constant 0 : i32
    %c0_i32_0 = arith.constant 0 : i32
    %c0_i32_1 = arith.constant 0 : i32
    %c0_i32_2 = arith.constant 0 : i32
    return %c0_i32, %c0_i32_0, %c0_i32_1 : i32, i32, i32
  }
  func.func @transform_5(%arg0: i32) -> (i32, i32, i32) {
    %c0_i32 = arith.constant 0 : i32
    %c0_i32_0 = arith.constant 0 : i32
    %c0_i32_1 = arith.constant 0 : i32
    %c0_i32_2 = arith.constant 0 : i32
    return %c0_i32, %c0_i32_0, %c0_i32_1 : i32, i32, i32
  }
  func.func @transform_6(%arg0: i32) -> (i32, i32, i32) {
    %c0_i32 = arith.constant 0 : i32
    %c0_i32_0 = arith.constant 0 : i32
    %c0_i32_1 = arith.constant 0 : i32
    %c0_i32_2 = arith.constant 0 : i32
    return %c0_i32, %c0_i32_0, %c0_i32_1 : i32, i32, i32
  }
  func.func @transform_7(%arg0: i32) -> (i32, i32) {
    %c0_i32 = arith.constant 0 : i32
    %c0_i32_0 = arith.constant 0 : i32
    %c0_i32_1 = arith.constant 0 : i32
    return %c0_i32, %c0_i32_0 : i32, i32
  }
  func.func @transform_8(%arg0: i32) -> (i32, i32, i32) {
    %c0_i32 = arith.constant 0 : i32
    %c0_i32_0 = arith.constant 0 : i32
    %c0_i32_1 = arith.constant 0 : i32
    return %arg0, %c0_i32, %c0_i32_0 : i32, i32, i32
  }
}

</mosaic_0001>

<bundles_post_ra>
// kernel: frame_reconstruction_pallas.1
= control target key start
LH: loop header
LB: loop body
LE: loop exit
PB: predicated region body
PF: predicated region fallthrough
CT: control target
= control target key end

     0   :  { %s2863_s27 = smov 0   ;;  %s3764_s0 = inlined_call_operand.vmem [shape: bf16[2,3,640], index: 0, kind: input, shape index: {}]   ;;  %s3765_s1 = inlined_call_operand.vmem [shape: bf16[16,27], index: 1, kind: input, shape index: {}]   ;;  %s3766_s2 = inlined_call_operand.vmem [shape: f32[16,1], index: 2, kind: input, shape index: {}]   ;;  %s3767_s3 = inlined_call_operand.vmem [shape: bf16[2,16,144], index: 3, kind: input, shape index: {}]   ;;  %s3768_s4 = inlined_call_operand.vmem [shape: f32[2,16,1], index: 4, kind: input, shape index: {}]   ;;  %s3769_s5 = inlined_call_operand.vmem [shape: bf16[2,16,144], index: 5, kind: input, shape index: {}]   ;;  %s3770_s6 = inlined_call_operand.vmem [shape: f32[2,16,1], index: 6, kind: input, shape index: {}]   ;;  %s3771_s7 = inlined_call_operand.vmem [shape: bf16[3,144], index: 7, kind: input, shape index: {}]   ;;  %s3772_s8 = inlined_call_operand.vmem [shape: f32[2,3,384], index: 8, kind: output, shape index: {}]  }
   0x1 LB: > { %s2491_s28 = sadd.s32 4294967295, %s2785_s27   ;;  %p2495_p0 = scmp.ge.s32.totalorder %s2785_s27, 1  ;;  %s2785_s27 = sphi %s2863_s27, %s18_s27  }
   0x2   : > { %p262_p1 = scmp.lt.s32.totalorder %s2785_s27, 3 }
   0x4   : > { %p263_p2 = pnand %p2495_p0, %p262_p1 }
   0x5   : > { %p296_p3 = scmp.lt.s32.totalorder (!%p263_p2), %s2491_s28, 1  ;;  %v307_v0 = vlaneseq (!%p263_p2)  ;;  %v2791_v1 = vmov (!%p263_p2), 1983009808   ;;  %s2792_s15 = smov (!%p263_p2), 126   ;;  %vm3773_vm0 = vcmask (!%p263_p2), 1031168   ;;  %vm435_vm1 = vcmask (!%p263_p2), 1039360  }
   0x6   : > { %266 = sbr.rel (%p263_p2) target bundleno = 2085 (0x825), region = 52  ;;  %v376_v2 = vunpack.c.l.s4 (!%p263_p2), %v2791_v1  ;;  %s2793_s16 = smov (!%p263_p2), 127   ;;  %vm611_vm2 = vcmask (!%p263_p2), 1041408   ;;  %vm612_vm3 = vsmask.f32 (!%p263_p2), 1280  ;;  %vm479_vm4 = vcmask (!%p263_p2), 850944  }
   0x7   : > { %v379_v3 = vshrl.u32 (!%p263_p2), %v307_v0, 7  ;;  %s2794_s17 = smov (!%p263_p2), 104   ;;  %s2795_s18 = smov (!%p263_p2), 103   ;;  %vm618_vm5 = vcmask (!%p263_p2), 1042432   ;;  %vm565_vm7 = vcmask (!%p263_p2), 654336   ;;  %vm502_vm9 = vcmask (!%p263_p2), 842752   ;;  %vm3015_vm12 = vmand (!%p263_p2), %vm611_vm2, %vm612_vm3 }
   0x8   : > { %v377_v4 = vunpack.c.0.s8 (!%p263_p2), %v376_v2  ;;  %s2796_s19 = smov (!%p263_p2), 102   ;;  %s2797_s20 = smov (!%p263_p2), 80   ;;  %vm636_vm8 = vsmask.f32 (!%p263_p2), 4352  ;;  %vm589_vm11 = vcmask (!%p263_p2), 646144   ;;  %vm542_vm13 = vcmask (!%p263_p2), 834560  }
   0x9   : > { %s2798_s21 = smov (!%p263_p2), 79   ;;  %s2799_s22 = smov (!%p263_p2), 78   ;;  %vm666_vm6 = vcmask (!%p263_p2), 1040384   ;;  %vm684_vm10 = vsmask.f32 (!%p263_p2), 2304  ;;  %vm607_vm2 = vcmask (!%p263_p2), 637952  }
   0xa   : > { %v2872_v5 = vsub.s32 (!%p263_p2), %v377_v4, %v379_v3  ;;  %vm690_vm3 = vcmask (!%p263_p2), 1043456   ;;  %vm3778_vm14 = vcmask (!%p263_p2), 1044480   ;;  %s2801_s23 = smov (!%p263_p2), 25   ;;  %s3234_s9 = smov (!%p263_p2), 0  }
   0xb   : > { %vm3055_vm15 = vmand (!%p263_p2), %vm3778_vm14, %vm636_vm8  ;;  %vm3781_vm8 = vsmask.f32 (!%p263_p2), 7424 }
   0xd   : > { %s3819_s28 = smov (!%p296_p3, %s2491_s28), 1 }
   0xe   : > { %s2701_s29 = smul.u32 10, %s3819_s28 }
   0xf   : > { %s2702_s30 = smul.u32 12, %s3819_s28 }
  0x10   : > { %s2877_s11 = scalar_lea.vmem %s3764_s0, %s2701_s29 }
  0x11   : > { %s2882_s14 = scalar_lea.vmem %s3772_s8, %s2702_s30  ;;  %v2885_v6 = vld [vmem:[%s2877_s11] sm:$0xff]  ;;  %v2498_v49 = vld.sshfl [vmem:[%s2877_s11 + $0x8] sm:$0x3 pattern:$0x76325410] }
  0x12   : > { %v2889_v7 = vrot.slane %v2885_v6, %v2872_v5  ;;  %v374_v8 = vcombine.high %v2885_v6, %v2885_v6  ;;  %v487_v48 = vcombine.low %v2885_v6, %v2885_v6  ;;  %v517_v54 = vshll.u32 %v2498_v49, 16 }
  0x14   : > { %v443_v9 = vrot.slane %v2889_v7, 5  ;;  %v2896_v10 = vcombine.high %v2889_v7, %v2889_v7  ;;  %v2899_v11 = vrot.slane %v374_v8, %v2872_v5  ;;  %v396_v12 = vshrl.u32 %v2889_v7, 16 }
  0x15   : > { %v399_v13 = vshll.u32 %v2889_v7, 16  ;;  %v495_v50 = vcombine.low %v2889_v7, %v2889_v7  ;;  %v494_v53 = vrot.slane %v487_v48, %v2872_v5  ;;  %v519_v57 = vrot.slane %v517_v54, 1 }
  0x16   : > { %447 = vrot.lane.b32.xlu1 %v443_v9, %s2792_s15  ;;  %v444_v14 = vrot.slane %v2896_v10, 5  ;;  %v445_v15 = vrot.slane %v2899_v11, 5  ;;  %v2908_v16 = vcombine.high %v2899_v11, %v2899_v11  ;;  %v398_v17 = vrot.slane %v396_v12, 6 }
  0x17   : > { %v401_v18 = vrot.slane %v399_v13, 7  ;;  %v2911_v19 = vshrl.u32 %v2896_v10, 16  ;;  %v2914_v20 = vshll.u32 %v2896_v10, 16  ;;  %v2917_v21 = vshrl.u32 %v2899_v11, 16 }
  0x18   : > { %449 = vrot.lane.b32.xlu0 %v444_v14, %s2792_s15  ;;  %v446_v22 = vrot.slane %v2908_v16, 5  ;;  %v2922_v23 = vshll.u32 %v2899_v11, 16  ;;  %v459_v32 = vrot.slane %v396_v12, 3  ;;  %v460_v34 = vrot.slane %v399_v13, 4 }
  0x19   : > { %v406_v24 = vrot.slane %v2911_v19, 6  ;;  %v409_v25 = vrot.slane %v2914_v20, 7  ;;  %v402_v26 = vor.u32 %v401_v18, %v398_v17  ;;  %v465_v27 = vrot.slane %v2917_v21, 3 }
  0x1a   : > { %451 = vrot.lane.b32.xlu1 %v445_v15, %s2792_s15  ;;  %v466_v28 = vrot.slane %v2922_v23, 4  ;;  %v414_v30 = vrot.slane %v2917_v21, 6  ;;  %v417_v31 = vrot.slane %v2922_v23, 7  ;;  %v420_v35 = vshrl.u32 %v2908_v16, 16 }
  0x1b   : > { %v410_v29 = vor.u32 %v409_v25, %v406_v24  ;;  %v423_v36 = vshll.u32 %v2908_v16, 16  ;;  %v462_v38 = vrot.slane %v2911_v19, 3  ;;  %v463_v39 = vrot.slane %v2914_v20, 4 }
  0x1c   : > { %453 = vrot.lane.b32.xlu0 %v446_v22, %s2792_s15  ;;  %v467_v33 = vor.u32 %v466_v28, %v465_v27  ;;  %v418_v37 = vor.u32 %v417_v31, %v414_v30  ;;  %v461_v40 = vor.u32 %v460_v34, %v459_v32  ;;  %v422_v41 = vrot.slane %v420_v35, 6 }
  0x1d   : > { %v425_v42 = vrot.slane %v423_v36, 7  ;;  %v464_v43 = vor.u32 %v463_v39, %v462_v38  ;;  %v468_v44 = vrot.slane %v420_v35, 3  ;;  %v469_v45 = vrot.slane %v423_v36, 4 }
  0x1e   : > { %427 = vrot.lane.b32.xlu1 %v402_v26, %s2793_s16  ;;  %v513_v51 = vrot.slane %v2914_v20, 1  ;;  %v514_v52 = vrot.slane %v2922_v23, 1  ;;  %v515_v56 = vrot.slane %v423_v36, 1  ;;  %v554_v62 = vrot.slane %v2899_v11, 7 }
  0x1f   : > { %v426_v46 = vor.u32 %v425_v42, %v422_v41  ;;  %v470_v47 = vor.u32 %v469_v45, %v468_v44  ;;  %v569_v63 = vrot.slane %v2911_v19, 5  ;;  %v570_v1 = vrot.slane %v2914_v20, 6 }
  0x20   : > { %429 = vrot.lane.b32.xlu0 %v410_v29, %s2793_s16  ;;  %v2752_v55 = vpack.i.bf16 %v514_v52, %v513_v51  ;;  %v520_v58 = vor.u32 %v513_v51, %v2911_v19  ;;  %v2757_v59 = vpack.i.bf16 %v519_v57, %v515_v56  ;;  %v522_v60 = vor.u32 %v515_v56, %v420_v35 }
  0x21   : > { %v521_v61 = vor.u32 %v514_v52, %v2917_v21  ;;  %v553_v2 = vrot.slane %v2896_v10, 7  ;;  %v571_v3 = vor.u32 %v570_v1, %v569_v63  ;;  %v575_v4 = vrot.slane %v420_v35, 5 }
  0x22   : > { %475 = vrot.lane.b32.xlu1 %v467_v33, %s2794_s17  ;;  %v576_v6 = vrot.slane %v423_v36, 6  ;;  %v555_v8 = vrot.slane %v2908_v16, 7  ;;  %v572_v9 = vrot.slane %v2917_v21, 5  ;;  %v573_v12 = vrot.slane %v2922_v23, 6 }
  0x23   : > { %v523_v15 = vshrl.u32 %v2498_v49, 16  ;;  %v556_v17 = vrot.slane %v2498_v49, 7  ;;  %v597_v19 = vcombine.low %v2899_v11, %v2899_v11  ;;  %v579_v21 = vrot.slane %v517_v54, 6 }
  0x24   : > { %431 = vrot.lane.b32.xlu0 %v418_v37, %s2793_s16  ;;  %v577_v13 = vor.u32 %v576_v6, %v575_v4  ;;  %v574_v14 = vor.u32 %v573_v12, %v572_v9  ;;  %v598_v23 = vcombine.low %v2498_v49, %v2498_v49 }
  0x25   : > { %v525_v18 = vor.u32 %v523_v15, %v519_v57  ;;  %v578_v20 = vrot.slane %v523_v15, 5 }
  0x26   : > { %471 = vrot.lane.b32.xlu1 %v461_v40, %s2794_s17 }
  0x27   : > { %v580_v22 = vor.u32 %v579_v21, %v578_v20 }
  0x28   : > { %473 = vrot.lane.b32.xlu0 %v464_v43, %s2794_s17 }
  0x2a   : > { %433 = vrot.lane.b32.xlu1 %v426_v46, %s2793_s16 }
  0x2c   : > { %477 = vrot.lane.b32.xlu0 %v470_v47, %s2794_s17 }
  0x2e   : > { %498 = vrot.lane.b32.xlu1 %v495_v50, %s2795_s18 }
  0x30   : > { %496 = vrot.lane.b32.xlu0 %v494_v53, %s2795_s18 }
  0x32   : > { %2753 = vrot.lane.b32.xlu1 %v2752_v55, %s2796_s19 }
  0x34   : > { %500 = vrot.lane.b32.xlu0 %v2889_v7, %s2795_s18 }
  0x36   : > { %534 = vrot.lane.b32.xlu1 %v520_v58, %s2796_s19 }
  0x38   : > { %2758 = vrot.lane.b32.xlu0 %v2757_v59, %s2796_s19 }
  0x3a   : > { %538 = vrot.lane.b32.xlu1 %v522_v60, %s2796_s19 }
  0x3c   : > { %536 = vrot.lane.b32.xlu0 %v521_v61, %s2796_s19 }
  0x3e   : > { %559 = vrot.lane.b32.xlu1 %v554_v62, %s2797_s20 }
  0x40   : > { %557 = vrot.lane.b32.xlu0 %v553_v2, %s2797_s20 }
  0x42   : > { %581 = vrot.lane.b32.xlu1 %v571_v3, %s2798_s21 }
  0x44   : > { %561 = vrot.lane.b32.xlu0 %v555_v8, %s2797_s20 }
  0x46   : > { %585 = vrot.lane.b32.xlu1 %v577_v13, %s2798_s21 }
  0x48   : > { %583 = vrot.lane.b32.xlu0 %v574_v14, %s2798_s21 }
  0x4a   : > { %563 = vrot.lane.b32.xlu1 %v556_v17, %s2797_s20 }
  0x4c   : > { %540 = vrot.lane.b32.xlu0 %v525_v18, %s2796_s19  ;;  %v2800_v18 = vmov 0.0  }
  0x4d   : > { %2571 = vmatprep.subr.bf16.mxu1 %v2800_v18 }
  0x4e   : > { %601 = vrot.lane.b32.xlu1 %v597_v19, %s2799_s22 }
  0x50   : > { %599 = vrot.lane.b32.xlu0 %v2889_v7, %s2799_s22 }
  0x52   : > { %587 = vrot.lane.b32.xlu1 %v580_v22, %s2798_s21 }
  0x54   : > { %603 = vrot.lane.b32.xlu0 %v2899_v11, %s2799_s22 }
  0x58   : > { %605 = vrot.lane.b32.xlu0 %v598_v23, %s2799_s22 }
  0x88   : > { %v2972_v24 = vpop.permute.xlu1 %447 }
  0x8a   : > { %v2974_v25 = vpop.permute.xlu0 %449 }
  0x8c   : > { %v2976_v26 = vpop.permute.xlu1 %451 }
  0x8d   : > { %v457_v57 = vsel %vm3773_vm0, %v2974_v25, %v2976_v26  ;;  %vm3047_vm0 = vmand %vm618_vm5, %vm684_vm10  ;;  %vm3782_vm10 = vcmask 1047552  }
  0x8e   : > { %v2978_v27 = vpop.permute.xlu0 %453  ;;  %vm3086_vm14 = vmand %vm3782_vm10, %vm3781_vm8  ;;  %vm3785_vm8 = vcmask 1045504   ;;  %vm3786_vm10 = vcmask 1031168  }
  0x90   : > { %v428_v28 = vpop.permute.xlu1 %427 }
  0x92   : > { %v430_v29 = vpop.permute.xlu0 %429 }
  0x93   : > { %v436_v53 = vsel %vm435_vm1, %v428_v28, %v430_v29 }
  0x94   : > { %v2980_v30 = vpop.permute.xlu1 %475  ;;  %v614_v59 = vsel %vm3015_vm12, %v2889_v7, %v436_v53 }
  0x96   : > { %v432_v31 = vpop.permute.xlu0 %431 }
  0x97   : > { %v437_v50 = vsel %vm435_vm1, %v430_v29, %v432_v31 }
  0x98   : > { %v2982_v32 = vpop.permute.xlu1 %471  ;;  %v615_v55 = vsel %vm3015_vm12, %v2896_v10, %v437_v50 }
  0x99   : > { %v625_v62 = vsel %vm618_vm5, %v615_v55, %v457_v57 }
  0x9a   : > { %v2984_v33 = vpop.permute.xlu0 %473 }
  0x9b   : > { %v481_v63 = vsel %vm479_vm4, %v2984_v33, %v2980_v30  ;;  %v480_v23 = vsel %vm479_vm4, %v2982_v32, %v2984_v33  ;;  %v456_v33 = vsel %vm3786_vm10, %v2972_v24, %v2974_v25 }
  0x9c   : > { %v2986_v34 = vpop.permute.xlu1 %433  ;;  %v639_v28 = vsel %vm3055_vm15, %v625_v62, %v481_v63  ;;  %v621_v52 = vsel %vm618_vm5, %v614_v59, %v456_v33  ;;  %v2802_v59 = vmov 0  }
  0x9d   : > { %v438_v1 = vsel %vm435_vm1, %v432_v31, %v2986_v34  ;;  %v617_v13 = vsel %vm3015_vm12, %v2908_v16, %v2986_v34  ;;  %362 = vst [vmem:[#allocation3] sm:$0xff] %v2802_v59  ;;  %366 = vst [vmem:[#allocation3 + $0x20] sm:$0xff] %v2802_v59  ;;  %800 = vmatprep.mubr.bf16.mxu0 %v2802_v59  ;;  %2762 = vset.pattern.permute.xlu1 %v2802_v59 }
  0x9e   : > { %v2988_v35 = vpop.permute.xlu0 %477  ;;  %v616_v29 = vsel %vm3015_vm12, %v2899_v11, %v438_v1  ;;  %vm3787_vm12 = vmmov %vm3786_vm10  ;;  %2763 = vset.pattern.permute.xlu0 %v2802_v59 }
  0x9f   : > { %v458_v50 = vsel %vm3787_vm12, %v2976_v26, %v2978_v27  ;;  %v482_v24 = vsel %vm479_vm4, %v2980_v30, %v2988_v35  ;;  %v638_v26 = vsel %vm3055_vm15, %v621_v52, %v480_v23  ;;  %vm3788_vm10 = vmmov %vm3785_vm8  ;;  %vm2803_vm4 = vmmov 0  }
  0xa0   : > { %v2990_v36 = vpop.permute.xlu1 %498  ;;  %v629_v25 = vsel %vm618_vm5, %v616_v29, %v458_v50  ;;  %2575 = vmatprep.mubr.msk.bf16.mxu1 %vm2803_vm4, %v2800_v18  ;;  %v2766_v29 = vld [vmem:[%s3765_s1] sm:$0xff]  }
  0xa2   : > { %v2992_v37 = vpop.permute.xlu0 %496 }
  0xa3   : > { %v503_v14 = vsel %vm502_vm9, %v2992_v37, %v2990_v36 }
  0xa4   : > { %v2994_v38 = vpop.permute.xlu1 %2753  ;;  %v649_v32 = vsel %vm3785_vm8, %v639_v28, %v503_v14 }
  0xa5   : > { %v2756_v10 = vunpack.i.h.bf16 %v2994_v38  ;;  %v2755_v60 = vunpack.i.l.bf16 %v2994_v38 }
  0xa6   : > { %v2996_v39 = vpop.permute.xlu0 %500 }
  0xa7   : > { %v543_v16 = vsel %vm542_vm13, %v2755_v60, %v2756_v10 }
  0xa8   : > { %v2998_v40 = vpop.permute.xlu1 %534  ;;  %v663_v11 = vsel %vm3086_vm14, %v649_v32, %v543_v16 }
  0xaa   : > { %v3000_v41 = vpop.permute.xlu0 %2758 }
  0xab   : > { %v2761_v19 = vunpack.i.h.bf16 %v3000_v41  ;;  %v2760_v20 = vunpack.i.l.bf16 %v3000_v41  ;;  %v633_v41 = vsel %vm618_vm5, %v617_v13, %v2978_v27  ;;  %v645_v27 = vsel %vm3785_vm8, %v638_v26, %v2992_v37  ;;  %vm3789_vm5 = vmmov %vm3785_vm8 }
  0xac   : > { %v3002_v42 = vpop.permute.xlu1 %538  ;;  %v641_v55 = vsel %vm3055_vm15, %v633_v41, %v2988_v35 }
  0xad   : > { %v545_v53 = vsel %vm542_vm13, %v2760_v20, %v2761_v19  ;;  %v657_v57 = vsel %vm3788_vm10, %v641_v55, %v2996_v39  ;;  %v544_v37 = vsel %vm542_vm13, %v2756_v10, %v2760_v20 }
  0xae   : > { %v537_v43 = vpop.permute.xlu0 %536  ;;  %v665_v35 = vsel %vm3086_vm14, %v657_v57, %v545_v53 }
  0xaf   : > { %v546_v61 = vsel %vm542_vm13, %v2998_v40, %v537_v43  ;;  %v547_v21 = vsel %vm542_vm13, %v537_v43, %v3002_v42 }
  0xb0   : > { %v560_v44 = vpop.permute.xlu1 %559 }
  0xb2   : > { %v3004_v45 = vpop.permute.xlu0 %557 }
  0xb3   : > { %v566_v56 = vsel %vm565_vm7, %v3004_v45, %v560_v44  ;;  %v669_v30 = vsel %vm666_vm6, %v2998_v40, %v3004_v45 }
  0xb4   : > { %v3006_v46 = vpop.permute.xlu1 %581  ;;  %v673_v2 = vsel %vm666_vm6, %v546_v61, %v566_v56  ;;  %v504_v56 = vsel %vm502_vm9, %v2990_v36, %v2996_v39  ;;  %v640_v39 = vsel %vm3055_vm15, %v629_v25, %v482_v24  ;;  %vm752_vm9 = vcmask 220160  }
  0xb5   : > { %v686_v45 = vsel %vm3047_vm0, %v669_v30, %v3006_v46  ;;  %v653_v10 = vsel %vm3789_vm5, %v640_v39, %v504_v56 }
  0xb6   : > { %v3008_v47 = vpop.permute.xlu0 %561  ;;  %v664_v61 = vsel %vm3086_vm14, %v653_v10, %v544_v37 }
  0xb7   : > { %v567_v8 = vsel %vm565_vm7, %v560_v44, %v3008_v47 }
  0xb8   : > { %v3010_v48 = vpop.permute.xlu1 %585  ;;  %v677_v31 = vsel %vm666_vm6, %v547_v21, %v567_v8 }
  0xba   : > { %v584_v49 = vpop.permute.xlu0 %583 }
  0xbb   : > { %v590_v58 = vsel %vm589_vm11, %v3006_v46, %v584_v49  ;;  %v591_v15 = vsel %vm589_vm11, %v584_v49, %v3010_v48 }
  0xbc   : > { %v3013_v51 = vpop.permute.xlu1 %563  ;;  %v687_v12 = vsel %vm3047_vm0, %v673_v2, %v590_v58  ;;  %v688_v44 = vsel %vm3047_vm0, %v677_v31, %v591_v15  ;;  %v662_v58 = vsel %vm3086_vm14, %v645_v27, %v2755_v60  ;;  %v308_v31 = vand.u32 127, %v307_v0 }
  0xbd   : > { %v568_v63 = vsel %vm565_vm7, %v3008_v47, %v3013_v51  ;;  %v372_v47 = vld [vmem:[%s3766_s2 + $0x8] sm:$0xff]  ;;  %vm3790_vm7 = vcmask 1044480  }
  0xbe   : > { %v3020_v54 = vpop.permute.xlu0 %540  ;;  %v310_v41 = vadd.s32 256, %v308_v31 }
  0xbf   : > { %v548_v38 = vsel %vm542_vm13, %v3002_v42, %v3020_v54 }
  0xc0   : > { %v602_v3 = vpop.permute.xlu1 %601  ;;  %v681_v42 = vsel %vm666_vm6, %v548_v38, %v568_v63  ;;  %vm742_vm6 = vcmask 203776  }
  0xc2   : > { %v3051_v4 = vpop.permute.xlu0 %599 }
  0xc3   : > { %v608_v9 = vsel %vm607_vm2, %v3051_v4, %v602_v3  ;;  %v693_v62 = vsel %vm690_vm3, %v686_v45, %v3051_v4  ;;  %v2804_v4 = vmov 65535  }
  0xc4   : > { %v696_v17 = vsel %vm690_vm3, %v687_v12, %v608_v9  ;;  %v588_v36 = vpop.permute.xlu1 %587  ;;  %v757_v6 = vsel %vm3790_vm7, 4294967295, %v2804_v4 }
  0xc5   : > { %736 = vrot.lane.b32.xlu1 %v696_v17, %s2801_s23  ;;  %v592_v60 = vsel %vm589_vm11, %v3010_v48, %v588_v36  ;;  %v371_v48 = vld [vmem:[%s3766_s2] sm:$0xff] }
  0xc6   : > { %v604_v34 = vpop.permute.xlu0 %603  ;;  %v689_v54 = vsel %vm3047_vm0, %v681_v42, %v592_v60  ;;  %vm3791_vm0 = vmmov %vm3789_vm5 }
  0xc7   : > { %v609_v43 = vsel %vm607_vm2, %v602_v3, %v604_v34  ;;  %v758_v9 = vsel %vm3791_vm0, %v757_v6, 0 }
  0xc8   : > { %v699_v49 = vsel %vm690_vm3, %v688_v44, %v609_v43  ;;  %v3198_v43 = vmul.u32.u64.low 2863311531, %v308_v31  ;;  %v3199_v44 = vmul.u32.u64.high 2863311531, %v308_v31, %v3198_v43 }
  0xc9   : > { %738 = vrot.lane.b32.xlu0 %v699_v49, %s2801_s23  ;;  %728 = vrot.lane.b32.xlu1 %v663_v11, %s2801_s23  ;;  %v3204_v49 = vmul.u32.u64.low 2863311531, %v310_v41  ;;  %v3205_v11 = vmul.u32.u64.high 2863311531, %v310_v41, %v3204_v49 }
  0xca   : > { %v606_v40 = vpop.permute.xlu0 %605  ;;  %v317_v50 = vshrl.u32 %v3199_v44, 4 }
  0xcb   : > { %v610_v46 = vsel %vm607_vm2, %v604_v34, %v606_v40  ;;  %v309_v34 = vadd.s32 128, %v308_v31  ;;  %v339_v53 = vshrl.u32 %v3205_v11, 4 }
  0xcc   : > { %v702_v1 = vsel %vm690_vm3, %v689_v54, %v610_v46  ;;  %v318_v24 = vmul.u32 24, %v317_v50 }
  0xcd   : > { %732 = vrot.lane.b32.xlu0 %v665_v35, %s2801_s23  ;;  %726 = vrot.lane.b32.xlu1 %v662_v58, %s2801_s23  ;;  %v3201_v32 = vmul.u32.u64.low 2863311531, %v309_v34  ;;  %v3202_v33 = vmul.u32.u64.high 2863311531, %v309_v34, %v3201_v32  ;;  %v340_v0 = vmul.u32 24, %v339_v53 }
  0xce   : > { %v319_v55 = vsub.s32 %v308_v31, %v318_v24 }
  0xcf   : > { %v328_v52 = vshrl.u32 %v3202_v33, 4  ;;  %v341_v27 = vsub.s32 %v310_v41, %v340_v0 }
  0xd0   : > { %vm344_vm11 = vcmp.ne.s32.totalorder %v319_v55, 0  ;;  %vm347_vm13 = vcmp.lt.s32.totalorder %v319_v55, 0  ;;  %v353_v56 = vadd.s32 24, %v319_v55 }
  0xd1   : > { %730 = vrot.lane.b32.xlu0 %v664_v61, %s2801_s23  ;;  %734 = vrot.lane.b32.xlu1 %v693_v62, %s2801_s23  ;;  %v329_v25 = vmul.u32 24, %v328_v52  ;;  %vm346_vm3 = vcmp.ne.s32.totalorder %v341_v27, 0  ;;  %vm349_vm14 = vcmp.lt.s32.totalorder %v341_v27, 0  ;;  %vm350_vm12 = vmand %vm347_vm13, %vm344_vm11  ;;  %v355_v30 = vadd.s32 24, %v341_v27 }
  0xd2   : > { %vm352_vm10 = vmand %vm349_vm14, %vm346_vm3  ;;  %v356_v35 = vsel %vm350_vm12, %v353_v56, %v319_v55 }
  0xd3   : > { %v330_v26 = vsub.s32 %v309_v34, %v329_v25  ;;  %v358_v37 = vsel %vm352_vm10, %v355_v30, %v341_v27  ;;  %vm3210_vm5 = vcmp.lt.s32.totalorder %v356_v35, 16 }
  0xd4   : > { %vm3218_vm0 = vcmp.lt.s32.totalorder %v358_v37, 16 }
  0xd5   : > { %740 = vrot.lane.b32.xlu0 %v702_v1, %s2801_s23  ;;  %705 = vperm.xlu1 %2762, %v371_v48   ;;  %vm345_vm15 = vcmp.ne.s32.totalorder %v330_v26, 0  ;;  %vm348_vm2 = vcmp.lt.s32.totalorder %v330_v26, 0  ;;  %v354_v57 = vadd.s32 24, %v330_v26 }
  0xd6   : > { %vm351_vm8 = vmand %vm348_vm2, %vm345_vm15 }
  0xd7   : > { %v357_v36 = vsel %vm351_vm8, %v354_v57, %v330_v26 }
  0xd8   : > { %vm3214_vm7 = vcmp.lt.s32.totalorder %v357_v36, 16 }
  0xd9   : > { %710 = vperm.xlu0 %2763, %v372_v47  }
 0x137   : > { %v737_v51 = vpop.permute.xlu1 %736 }
 0x13b   : > { %v739_v2 = vpop.permute.xlu0 %738  ;;  %v729_v3 = vpop.permute.xlu1 %728 }
 0x13c   : > { %v747_v12 = vsel %vm742_vm6, %v737_v51, %v739_v2 }
 0x13d   : > { %v763_v19 = vand.u32 %v758_v9, %v747_v12 }
 0x13f   : > { %v733_v8 = vpop.permute.xlu0 %732  ;;  %v727_v7 = vpop.permute.xlu1 %726 }
 0x140   : > { %v743_v21 = vsel %vm742_vm6, %v727_v7, %v729_v3 }
 0x143   : > { %v731_v13 = vpop.permute.xlu0 %730  ;;  %v735_v14 = vpop.permute.xlu1 %734 }
 0x144   : > { %v744_v15 = vsel %vm742_vm6, %v729_v3, %v731_v13  ;;  %v745_v17 = vsel %vm742_vm6, %v731_v13, %v733_v8  ;;  %v746_v20 = vsel %vm742_vm6, %v735_v14, %v737_v51 }
 0x145   : > { %768 = vmatprep.subr.bf16.mxu0 %v744_v15  ;;  %2572 = vmatpush3.bf16.msra.mxu1 %v745_v17  ;;  %v760_v22 = vand.u32 %v758_v9, %v746_v20 }
 0x146   : > { %769 = vmatpush1.bf16.msra.mxu0 %v743_v21  ;;  %2573 = vmatprep.subr.bf16.mxu1 %v2800_v18 }
 0x147   : > { %v741_v16 = vpop.permute.xlu0 %740  ;;  %770 = vmatprep.subr.bf16.mxu0 %v763_v19 }
 0x148   : > { %v748_v23 = vsel %vm742_vm6, %v739_v2, %v741_v16 }
 0x149   : > { %v766_v28 = vand.u32 %v758_v9, %v748_v23 }
 0x14a   : > { %771 = vmatpush1.bf16.msra.mxu0 %v760_v22 }
 0x14b   : > { %2574 = vmatpush3.bf16.msra.mxu1 %v766_v28 }
 0x14d   : > { %2500 = vmatmul.mubr.msk.bf16.vlgmr.msra.gmra.mrb[0].mxu0 %vm752_vm9, %v2766_v29 }
 0x14e   : > { %2576 = vmatmul.mubr.msk.bf16.vlgmr.msra.gmra.mrb[0].mxu1 %vm752_vm9, %v2766_v29 }
 0x154   : > { %v706_v58 = vpop.permute.xlu1 %705 }
 0x158   : > { %v711_v40 = vpop.permute.xlu0 %710 }
 0x220   : > { %v802_v39 = vpop.f32.mrb[0].mxu0 }
 0x221   : > { %v803_v38 = vadd.f32 %v802_v39, %v706_v58  ;;  %v804_v60 = vpop.f32.mrb[1].mxu0  ;;  %v845_v62 = vpop.f32.mrb[0].mxu1 }
 0x222   : > { %v805_v63 = vadd.f32 %v804_v60, %v706_v58  ;;  %v846_v46 = vadd.f32 %v845_v62, %v706_v58  ;;  %v2577_v42 = vpop.f32.mrb[1].mxu1  ;;  %v806_v48 = vpop.f32.mrb[2].mxu0 }
 0x223   : > { %v807_v54 = vadd.f32 %v806_v48, %v711_v40  ;;  %v858_v1 = vsel %vm3210_vm5, %v803_v38, 0.0  ;;  %v808_v47 = vpop.f32.mrb[3].mxu0  ;;  %v848_v51 = vpop.f32.mrb[2].mxu1 }
 0x224   : > { %v859_v2 = vsel %vm3214_vm7, %v805_v63, 0.0  ;;  %v860_v3 = vsel %vm3218_vm0, %v846_v46, 0.0  ;;  %864 = vst [vmem:[#allocation2] sm:$0xff] %v858_v1  ;;  %v809_v4 = vadd.f32 %v808_v47, %v711_v40  ;;  %v849_v6 = vadd.f32 %v848_v51, %v711_v40  ;;  %v2578_v8 = vpop.f32.mrb[3].mxu1 }
 0x225   : > { %865 = vst [vmem:[#allocation2 + $0x8] sm:$0xff] %v859_v2  ;;  %866 = vst [vmem:[#allocation2 + $0x10] sm:$0xff] %v860_v3  ;;  %v861_v7 = vsel %vm3210_vm5, %v807_v54, 0.0 }
 0x226   : > { %867 = vst [vmem:[#allocation2 + $0x18] sm:$0xff] %v861_v7  ;;  %v862_v9 = vsel %vm3214_vm7, %v809_v4, 0.0  ;;  %v863_v12 = vsel %vm3218_vm0, %v849_v6, 0.0 }
 0x227   : > { %868 = vst [vmem:[#allocation2 + $0x20] sm:$0xff] %v862_v9  ;;  %869 = vst [vmem:[#allocation2 + $0x28] sm:$0xff] %v863_v12 }
 0x228 LB: >> { %v3239_v13 = vld [vmem:[#allocation3 + $0x20] sm:$0xff]  ;;  %s2805_s10 = smov 126   ;;  %s2806_s11 = smov 127   ;;  %v2810_v33 = vmov 0.0   ;;  %vm3798_vm9 = vcmask 1031168   ;;  %vm2812_vm13 = vmmov 0   ;;  %s2789_s9 = sphi %s3234_s9, %s875_s9  }
 0x229   : >> { %v3241_v14 = vld [vmem:[#allocation3] sm:$0xff]  ;;  %947 = vrot.lane.b32.xlu0 %v3239_v13, %s2805_s10  ;;  %s3248_s12 = sshll.u32 %s2789_s9, 4  ;;  %s2807_s19 = smov 1   ;;  %2579 = vmatprep.subr.bf16.mxu1 %v2810_v33  ;;  %vm3799_vm11 = vmmov %vm3798_vm9  ;;  %v2813_v58 = vmov 0   ;;  %vm983_vm3 = vcmask 7168   ;;  %vm1002_vm8 = vcmask 392192  }
 0x22a   : >> { %911 = vrot.lane.b32.xlu1 %v3241_v14, %s2806_s11  ;;  %s3254_s18 = scalar_lea.vmem %s3767_s3, %s3248_s12  ;;  %s2808_s21 = smov 25   ;;  %2585 = vmatprep.mubr.msk.bf16.mxu1 %vm2812_vm13, %v2810_v33  ;;  %vm3800_vm15 = vmmov %vm3798_vm9  ;;  %vm1263_vm10 = vcmask 859136  }
 0x22b   : >> { %v876_v20 = vld [vmem:[#allocation2] sm:$0xff]  ;;  %s2809_s22 = smov 80   ;;  %s2811_s24 = smov 105   ;;  %1038 = vmatprep.mubr.bf16.mxu0 %v2813_v58  ;;  %2767 = vset.pattern.permute.xlu1 %v2813_v58  ;;  %vm3801_vm2 = vmmov %vm3798_vm9 }
 0x22c   : >> { %v878_v15 = vld [vmem:[#allocation2 + $0x10] sm:$0xff]  ;;  %v882_v22 = vmax.f32 %v876_v20, 0.0  ;;  %v877_v28 = vld [vmem:[#allocation2 + $0x8] sm:$0xff]  ;;  %2768 = vset.pattern.permute.xlu0 %v2813_v58  ;;  %vm3802_vm14 = vmmov %vm3801_vm2  ;;  %s2814_s25 = smov 32   ;;  %s900_s29 = scalar_lea.vmem %s3768_s4, %s3248_s12 }
 0x22d   : >> { %v884_v19 = vmax.f32 %v878_v15, 0.0  ;;  %v879_v21 = vld [vmem:[#allocation2 + $0x18] sm:$0xff]  ;;  %v883_v31 = vmax.f32 %v877_v28, 0.0  ;;  %v3280_v32 = vld [vmem:[%s3254_s18] ss:$8 sps:$4 sm:$0xff]   ;;  %vm3803_vm12 = vmmov %vm3801_vm2  ;;  %s3426_s17 = scalar_lea.vmem %s3769_s5, %s3248_s12  ;;  %s875_s9 = sadd.s32 1, %s2789_s9  }
 0x22e   : >> { %v881_v17 = vld [vmem:[#allocation2 + $0x28] sm:$0xff]  ;;  %v885_v23 = vmax.f32 %v879_v21, 0.0  ;;  %v880_v29 = vld [vmem:[#allocation2 + $0x20] sm:$0xff]  ;;  %p872_p4 = scmp.ge.s32.totalorder %s875_s9, 2  }
 0x22f   : >> { %v887_v16 = vmax.f32 %v881_v17, 0.0  ;;  %v886_v34 = vmax.f32 %v880_v29, 0.0  ;;  %v2771_v7 = vld [vmem:[%s3254_s18 + $0x4] ss:$8 sps:$4 sm:$0xff]   ;;  %s1413_s18 = scalar_lea.vmem %s3770_s6, %s3248_s12  ;;  %v1937_v45 = vld [vmem:[#allocation3] sm:$0xff] (%p872_p4)  ;;  %s2815_s9 = smov (%p872_p4), 1  }
 0x230   : >> { %v888_v43 = vpack.c.bf16 %v885_v23, %v882_v22  ;;  %v902_v9 = vld [vmem:[%s900_s29 + $0x8] sm:$0xff]  ;;  %v901_v12 = vld [vmem:[%s900_s29] sm:$0xff]  ;;  %v1970_v10 = vld [vmem:[#allocation3 + $0x20] sm:$0xff] (%p872_p4) }
 0x231   : >> { %v890_v41 = vpack.c.bf16 %v887_v16, %v884_v19  ;;  %v889_v44 = vpack.c.bf16 %v886_v34, %v883_v31  ;;  %v3637_v61 = vld [vmem:[%s3771_s7] sm:$0xf] (%p872_p4) }
 0x232   : >> { %913 = vrot.lane.b32.xlu0 %v888_v43, %s2806_s11 }
 0x233   : >> { %917 = vrot.lane.b32.xlu1 %v890_v41, %s2806_s11 }
 0x236   : >> { %915 = vrot.lane.b32.xlu0 %v889_v44, %s2806_s11 }
 0x237   : >> { %941 = vrot.lane.b32.xlu1 %v888_v43, %s2805_s10 }
 0x23a   : >> { %943 = vrot.lane.b32.xlu0 %v889_v44, %s2805_s10 }
 0x23b   : >> { %945 = vrot.lane.b32.xlu1 %v890_v41, %s2805_s10 }
 0x23e   : >> { %924 = vrot.lane.b32.xlu0 %v888_v43, %s2805_s10 }
 0x23f   : >> { %926 = vrot.lane.b32.xlu1 %v889_v44, %s2805_s10 }
 0x242   : >> { %928 = vrot.lane.b32.xlu0 %v890_v41, %s2805_s10 }
 0x243   : >> { %922 = vrot.lane.b32.xlu1 %v3241_v14, %s2805_s10 }
 0x246   : >> { %1221 = vrot.lane.b32.xlu0 %v889_v44, %s2806_s11 }
 0x247   : >> { %1223 = vrot.lane.b32.xlu1 %v890_v41, %s2806_s11 }
 0x24a   : >> { %1225 = vrot.lane.b32.xlu0 %v3239_v13, %s2806_s11 }
 0x24b   : >> { %1219 = vrot.lane.b32.xlu1 %v888_v43, %s2806_s11 }
 0x24e   : >> { %961 = vrot.lane.b32.xlu0 %v888_v43, %s2807_s19 }
 0x24f   : >> { %963 = vrot.lane.b32.xlu1 %v889_v44, %s2807_s19 }
 0x252   : >> { %965 = vrot.lane.b32.xlu0 %v890_v41, %s2807_s19 }
 0x253   : >> { %959 = vrot.lane.b32.xlu1 %v3241_v14, %s2807_s19 }
 0x256   : >> { %1092 = vrot.lane.b32.xlu0 %v888_v43, %s2808_s21 }
 0x257   : >> { %1094 = vrot.lane.b32.xlu1 %v889_v44, %s2808_s21 }
 0x25a   : >> { %1096 = vrot.lane.b32.xlu0 %v890_v41, %s2808_s21 }
 0x25b   : >> { %957 = vrot.lane.b32.xlu1 %v3280_v32, %s2809_s22 }
 0x25e   : >> { %1090 = vrot.lane.b32.xlu0 %v3241_v14, %s2808_s21 }
 0x25f   : >> { %1241 = vrot.lane.b32.xlu1 %v889_v44, %s2811_s24 }
 0x262   : >> { %1243 = vrot.lane.b32.xlu0 %v890_v41, %s2811_s24 }
 0x263   : >> { %1245 = vrot.lane.b32.xlu1 %v3239_v13, %s2811_s24 }
 0x266   : >> { %1239 = vrot.lane.b32.xlu0 %v888_v43, %s2811_s24 }
 0x29b   : >> { %v3293_v49 = vpop.permute.xlu0 %947 }
 0x29c   : >> { %v912_v11 = vpop.permute.xlu1 %911 }
 0x2a4   : >> { %v914_v52 = vpop.permute.xlu0 %913 }
 0x2a5   : >> { %v918_v50 = vpop.permute.xlu1 %917  ;;  %967 = vrot.lane.b32.xlu1 %v914_v52, %s2807_s19  ;;  %v919_v40 = vsel %vm435_vm1, %v912_v11, %v914_v52 }
 0x2a6   : >> { %973 = vrot.lane.b32.xlu0 %v918_v50, %s2807_s19 }
 0x2a8   : >> { %v916_v24 = vpop.permute.xlu0 %915 }
 0x2a9   : >> { %v942_v53 = vpop.permute.xlu1 %941  ;;  %v920_v25 = vsel %vm435_vm1, %v914_v52, %v916_v24  ;;  %v921_v36 = vsel %vm435_vm1, %v916_v24, %v918_v50 }
 0x2aa   : >> { %975 = vrot.lane.b32.xlu1 %v942_v53, %s2807_s19  ;;  %969 = vrot.lane.b32.xlu0 %v920_v25, %s2807_s19 }
 0x2ac   : >> { %v944_v55 = vpop.permute.xlu0 %943 }
 0x2ad   : >> { %v946_v0 = vpop.permute.xlu1 %945  ;;  %v949_v26 = vsel %vm3798_vm9, %v942_v53, %v944_v55  ;;  %vm1237_vm9 = vcmask 261120  }
 0x2ae   : >> { %1104 = vrot.lane.b32.xlu1 %v918_v50, %s2808_s21  ;;  %977 = vrot.lane.b32.xlu0 %v949_v26, %s2807_s19  ;;  %v951_v57 = vsel %vm3799_vm11, %v946_v0, %v3293_v49  ;;  %v950_v60 = vsel %vm3800_vm15, %v944_v55, %v946_v0  ;;  %vm3804_vm11 = vmmov %vm3801_vm2 }
 0x2af   : >> { %vm3805_vm15 = vmmov %vm3801_vm2 }
 0x2b0   : >> { %v925_v56 = vpop.permute.xlu0 %924 }
 0x2b1   : >> { %v927_v27 = vpop.permute.xlu1 %926 }
 0x2b2   : >> { %981 = vrot.lane.b32.xlu0 %v951_v57, %s2807_s19  ;;  %v931_v4 = vsel %vm3803_vm12, %v925_v56, %v927_v27  ;;  %vm3807_vm12 = vmmov %vm3801_vm2 }
 0x2b4   : >> { %v929_v35 = vpop.permute.xlu0 %928 }
 0x2b5   : >> { %v923_v30 = vpop.permute.xlu1 %922  ;;  %1112 = vrot.lane.b32.xlu1 %v929_v35, %s2808_s21  ;;  %v932_v63 = vsel %vm3801_vm2, %v927_v27, %v929_v35 }
 0x2b6   : >> { %1102 = vrot.lane.b32.xlu0 %v921_v36, %s2808_s21  ;;  %v930_v48 = vsel %vm3802_vm14, %v923_v30, %v925_v56  ;;  %vm3806_vm14 = vmmov %vm3801_vm2 }
 0x2b8   : >> { %v1222_v39 = vpop.permute.xlu0 %1221 }
 0x2b9   : >> { %v1224_v37 = vpop.permute.xlu1 %1223  ;;  %971 = vrot.lane.b32.xlu1 %v921_v36, %s2807_s19 }
 0x2ba   : >> { %1098 = vrot.lane.b32.xlu0 %v919_v40, %s2808_s21  ;;  %v1228_v8 = vsel %vm435_vm1, %v1222_v39, %v1224_v37 }
 0x2bc   : >> { %v1226_v62 = vpop.permute.xlu0 %1225 }
 0x2bd   : >> { %v1220_v38 = vpop.permute.xlu1 %1219  ;;  %979 = vrot.lane.b32.xlu1 %v950_v60, %s2807_s19  ;;  %v1229_v51 = vsel %vm435_vm1, %v1224_v37, %v1226_v62 }
 0x2be   : >> { %1110 = vrot.lane.b32.xlu0 %v932_v63, %s2808_s21  ;;  %v1227_v6 = vsel %vm435_vm1, %v1220_v38, %v1222_v39 }
 0x2c0   : >> { %v962_v46 = vpop.permute.xlu0 %961 }
 0x2c1   : >> { %v964_v42 = vpop.permute.xlu1 %963  ;;  %1253 = vrot.lane.b32.xlu1 %v1226_v62, %s2811_s24 }
 0x2c2   : >> { %v985_v54 = vsel %vm983_vm3, %v962_v46, %v964_v42  ;;  %1106 = vrot.lane.b32.xlu0 %v930_v48, %s2808_s21 }
 0x2c3   : >> { %1006 = vmatprep.subr.bf16.mxu0 %v985_v54 }
 0x2c4   : >> { %v966_v1 = vpop.permute.xlu0 %965 }
 0x2c5   : >> { %v960_v47 = vpop.permute.xlu1 %959  ;;  %1100 = vrot.lane.b32.xlu1 %v920_v25, %s2808_s21  ;;  %v986_v3 = vsel %vm983_vm3, %v964_v42, %v966_v1 }
 0x2c6   : >> { %v984_v2 = vsel %vm983_vm3, %v960_v47, %v962_v46  ;;  %1251 = vrot.lane.b32.xlu0 %v1229_v51, %s2811_s24  ;;  %2580 = vmatpush3.bf16.msra.mxu1 %v986_v3 }
 0x2c7   : >> { %1007 = vmatpush1.bf16.msra.mxu0 %v984_v2  ;;  %2581 = vmatprep.subr.bf16.mxu1 %v2810_v33 }
 0x2c8   : >> { %v1093_v15 = vpop.permute.xlu0 %1092 }
 0x2c9   : >> { %1108 = vrot.lane.b32.xlu1 %v931_v4, %s2808_s21  ;;  %v1095_v17 = vpop.permute.xlu1 %1094 }
 0x2ca   : >> { %1247 = vrot.lane.b32.xlu0 %v1227_v6, %s2811_s24  ;;  %v1115_v30 = vsel %vm742_vm6, %v1093_v15, %v1095_v17 }
 0x2cc   : >> { %v1097_v19 = vpop.permute.xlu0 %1096 }
 0x2cd   : >> { %1261 = vrot.lane.b32.xlu1 %v3293_v49, %s2811_s24  ;;  %v958_v20 = vpop.permute.xlu1 %957  ;;  %v1116_v36 = vsel %vm742_vm6, %v1095_v17, %v1097_v19 }
 0x2ce   : >> { %1259 = vrot.lane.b32.xlu0 %v951_v57, %s2811_s24 }
 0x2d0   : >> { %v1091_v21 = vpop.permute.xlu0 %1090 }
 0x2d1   : >> { %1249 = vrot.lane.b32.xlu1 %v1228_v8, %s2811_s24  ;;  %v3360_v22 = vpop.permute.xlu1 %1241  ;;  %v1114_v39 = vsel %vm742_vm6, %v1091_v21, %v1093_v15 }
 0x2d2   : >> { %1255 = vrot.lane.b32.xlu0 %v949_v26, %s2811_s24 }
 0x2d4   : >> { %v3358_v16 = vpop.permute.xlu0 %1243 }
 0x2d5   : >> { %1257 = vrot.lane.b32.xlu1 %v950_v60, %s2811_s24  ;;  %v3364_v28 = vpop.permute.xlu1 %1245  ;;  %v1265_v47 = vsel %vm1263_vm10, %v3360_v22, %v3358_v16 }
 0x2d6   : >> { %1235 = vrot.lane.b32.xlu0 %v2771_v7, %s2814_s25  ;;  %v1266_v2 = vsel %vm1263_vm10, %v3358_v16, %v3364_v28 }
 0x2d8   : >> { %v3362_v23 = vpop.permute.xlu0 %1239 }
 0x2d9   : >> { %1233 = vrot.lane.b32.xlu1 %v3280_v32, %s2814_s25  ;;  %v1264_v4 = vsel %vm1263_vm10, %v3362_v23, %v3360_v22 }
 0x2da   : >> { %1382 = vperm.xlu0 %2768, %v902_v9  }
 0x2dd   : >> { %1377 = vperm.xlu1 %2767, %v901_v12  }
 0x2de   : >> { %1460 = vrot.lane.b32.xlu0 %v3239_v13, %s2805_s10 }
 0x2e1   : >> { %1424 = vrot.lane.b32.xlu1 %v3241_v14, %s2806_s11 }
 0x2e2   : >> { %1736 = vrot.lane.b32.xlu0 %v3239_v13, %s2806_s11 }
 0x2e5   : >> { %1435 = vrot.lane.b32.xlu1 %v3241_v14, %s2805_s10 }
 0x317   : >> { %v968_v29 = vpop.permute.xlu1 %967 }
 0x318   : >> { %v974_v31 = vpop.permute.xlu0 %973 }
 0x31c   : >> { %v970_v34 = vpop.permute.xlu0 %969  ;;  %v976_v41 = vpop.permute.xlu1 %975 }
 0x31d   : >> { %v987_v0 = vsel %vm983_vm3, %v968_v29, %v970_v34 }
 0x320   : >> { %v978_v43 = vpop.permute.xlu0 %977  ;;  %v1105_v44 = vpop.permute.xlu1 %1104 }
 0x321   : >> { %v990_v57 = vsel %vm983_vm3, %v976_v41, %v978_v43 }
 0x324   : >> { %v982_v49 = vpop.permute.xlu0 %981 }
 0x327   : >> { %v1113_v11 = vpop.permute.xlu1 %1112 }
 0x328   : >> { %v1103_v50 = vpop.permute.xlu0 %1102 }
 0x329   : >> { %v1119_v38 = vsel %vm742_vm6, %v1103_v50, %v1105_v44 }
 0x32b   : >> { %v972_v52 = vpop.permute.xlu1 %971 }
 0x32c   : >> { %v1099_v53 = vpop.permute.xlu0 %1098  ;;  %v988_v24 = vsel %vm983_vm3, %v970_v34, %v972_v52  ;;  %v989_v25 = vsel %vm983_vm3, %v972_v52, %v974_v31 }
 0x32d   : >> { %1008 = vmatprep.subr.bf16.mxu0 %v988_v24  ;;  %2582 = vmatpush3.bf16.msra.mxu1 %v989_v25 }
 0x32e   : >> { %1009 = vmatpush1.bf16.msra.mxu0 %v987_v0  ;;  %2583 = vmatprep.subr.bf16.mxu1 %v2810_v33 }
 0x32f   : >> { %v980_v55 = vpop.permute.xlu1 %979 }
 0x330   : >> { %v1111_v26 = vpop.permute.xlu0 %1110  ;;  %v991_v27 = vsel %vm983_vm3, %v978_v43, %v980_v55  ;;  %v992_v56 = vsel %vm983_vm3, %v980_v55, %v982_v49 }
 0x331   : >> { %1010 = vmatprep.subr.bf16.mxu0 %v991_v27  ;;  %2584 = vmatpush3.bf16.msra.mxu1 %v992_v56  ;;  %v1122_v42 = vsel %vm742_vm6, %v1111_v26, %v1113_v11 }
 0x332   : >> { %1011 = vmatpush1.bf16.msra.mxu0 %v990_v57  ;;  %2589 = vmatprep.subr.bf16.mxu1 %v2810_v33 }
 0x333   : >> { %1135 = vmatprep.subr.bf16.mxu0 %v1115_v30  ;;  %v1254_v35 = vpop.permute.xlu1 %1253 }
 0x334   : >> { %v1107_v37 = vpop.permute.xlu0 %1106  ;;  %2586 = vmatmul.mubr.msk.bf16.vlgmr.msra.gmra.mrb[0].mxu1 %vm1002_vm8, %v958_v20 }
 0x335   : >> { %2506 = vmatmul.mubr.msk.bf16.vlgmr.msra.gmra.mrb[0].mxu0 %vm1002_vm8, %v958_v20  ;;  %2590 = vmatpush3.bf16.msra.mxu1 %v1116_v36 }
 0x336   : >> { %1136 = vmatpush1.bf16.msra.mxu0 %v1114_v39  ;;  %2591 = vmatprep.subr.bf16.mxu1 %v2810_v33 }
 0x337   : >> { %v1101_v40 = vpop.permute.xlu1 %1100  ;;  %2595 = vmatprep.mubr.msk.bf16.mxu1 %vm2812_vm13, %v2810_v33  ;;  %1167 = vmatprep.mubr.bf16.mxu0 %v2813_v58 }
 0x338   : >> { %v1117_v60 = vsel %vm742_vm6, %v1099_v53, %v1101_v40  ;;  %v1252_v62 = vpop.permute.xlu0 %1251  ;;  %v1118_v63 = vsel %vm742_vm6, %v1101_v40, %v1103_v50 }
 0x339   : >> { %1137 = vmatprep.subr.bf16.mxu0 %v1118_v63  ;;  %2592 = vmatpush3.bf16.msra.mxu1 %v1119_v38  ;;  %v1269_v8 = vsel %vm1263_vm10, %v1252_v62, %v1254_v35 }
 0x33a   : >> { %1138 = vmatpush1.bf16.msra.mxu0 %v1117_v60  ;;  %2593 = vmatprep.subr.bf16.mxu1 %v2810_v33 }
 0x33b   : >> { %v1109_v46 = vpop.permute.xlu1 %1108 }
 0x33c   : >> { %v1120_v48 = vsel %vm742_vm6, %v1107_v37, %v1109_v46  ;;  %v1248_v54 = vpop.permute.xlu0 %1247  ;;  %v1121_v1 = vsel %vm742_vm6, %v1109_v46, %v1111_v26 }
 0x33d   : >> { %1139 = vmatprep.subr.bf16.mxu0 %v1121_v1  ;;  %2594 = vmatpush3.bf16.msra.mxu1 %v1122_v42 }
 0x33e   : >> { %1140 = vmatpush1.bf16.msra.mxu0 %v1120_v48  ;;  %2599 = vmatprep.subr.bf16.mxu1 %v2810_v33 }
 0x33f   : >> { %1285 = vmatprep.subr.bf16.mxu0 %v1265_v47  ;;  %v1262_v51 = vpop.permute.xlu1 %1261 }
 0x340   : >> { %v1260_v3 = vpop.permute.xlu0 %1259  ;;  %2596 = vmatmul.mubr.msk.bf16.vlgmr.msra.gmra.mrb[4].mxu1 %vm1002_vm8, %v3280_v32 }
 0x341   : >> { %2508 = vmatmul.mubr.msk.bf16.vlgmr.msra.gmra.mrb[0].mxu0 %vm1002_vm8, %v3280_v32  ;;  %2600 = vmatpush3.bf16.msra.mxu1 %v1266_v2  ;;  %v1272_v15 = vsel %vm1263_vm10, %v1260_v3, %v1262_v51 }
 0x342   : >> { %1286 = vmatpush1.bf16.msra.mxu0 %v1264_v4  ;;  %2601 = vmatprep.subr.bf16.mxu1 %v2810_v33 }
 0x343   : >> { %v1250_v6 = vpop.permute.xlu1 %1249  ;;  %1317 = vmatprep.mubr.bf16.mxu0 %v2813_v58  ;;  %2605 = vmatprep.mubr.msk.bf16.mxu1 %vm2812_vm13, %v2810_v33 }
 0x344   : >> { %v1267_v7 = vsel %vm1263_vm10, %v1248_v54, %v1250_v6  ;;  %v1268_v9 = vsel %vm1263_vm10, %v1250_v6, %v1252_v62  ;;  %v1256_v12 = vpop.permute.xlu0 %1255 }
 0x345   : >> { %1287 = vmatprep.subr.bf16.mxu0 %v1268_v9  ;;  %2602 = vmatpush3.bf16.msra.mxu1 %v1269_v8  ;;  %v3457_v8 = vld [vmem:[%s3426_s17] ss:$8 sps:$4 sm:$0xff]  }
 0x346   : >> { %1288 = vmatpush1.bf16.msra.mxu0 %v1267_v7  ;;  %2603 = vmatprep.subr.bf16.mxu1 %v2810_v33 }
 0x347   : >> { %v1258_v32 = vpop.permute.xlu1 %1257 }
 0x348   : >> { %v1270_v17 = vsel %vm1263_vm10, %v1256_v12, %v1258_v32  ;;  %v1271_v19 = vsel %vm1263_vm10, %v1258_v32, %v1260_v3  ;;  %v1236_v20 = vpop.permute.xlu0 %1235 }
 0x349   : >> { %1289 = vmatprep.subr.bf16.mxu0 %v1271_v19  ;;  %2604 = vmatpush3.bf16.msra.mxu1 %v1272_v15 }
 0x34a   : >> { %1290 = vmatpush1.bf16.msra.mxu0 %v1270_v17  ;;  %2609 = vmatprep.subr.bf16.mxu1 %v2810_v33 }
 0x34b   : >> { %v1234_v21 = vpop.permute.xlu1 %1233 }
 0x34c   : >> { %v1238_v16 = vsel %vm1237_vm9, %v1234_v21, %v1236_v20 }
 0x34d   : >> { %2511 = vmatmul.mubr.msk.bf16.vlgmr.msra.gmra.mrb[0].mxu0 %vm1002_vm8, %v1238_v16  ;;  %2606 = vmatmul.mubr.msk.bf16.vlgmr.msra.gmra.mrb[8].mxu1 %vm1002_vm8, %v1238_v16 }
 0x34e   : >> { %2615 = vmatprep.mubr.msk.bf16.mxu1 %vm2812_vm13, %v2810_v33  ;;  %1549 = vmatprep.mubr.bf16.mxu0 %v2813_v58 }
 0x359   : >> { %v1383_v50 = vpop.permute.xlu0 %1382 }
 0x35c   : >> { %v1378_v11 = vpop.permute.xlu1 %1377 }
 0x360   : >> { %v1425_v7 = vpop.permute.xlu1 %1424 }
 0x364   : >> { %v1436_v12 = vpop.permute.xlu1 %1435 }
 0x407   : >> { %v1083_v22 = vpop.f32.mrb[0].mxu1 }
 0x408   : >> { %v2587_v23 = vpop.f32.mrb[1].mxu1 }
 0x409   : >> { %v1086_v28 = vpop.f32.mrb[2].mxu1 }
 0x40a   : >> { %v2588_v29 = vpop.f32.mrb[3].mxu1 }
 0x413   : >> { %v1212_v31 = vpop.f32.mrb[4].mxu1 }
 0x414   : >> { %v1213_v34 = vadd.f32 %v1212_v31, %v1083_v22  ;;  %v2597_v41 = vpop.f32.mrb[5].mxu1 }
 0x415   : >> { %v1215_v43 = vpop.f32.mrb[6].mxu1 }
 0x416   : >> { %v1216_v44 = vadd.f32 %v1215_v43, %v1086_v28  ;;  %v2598_v49 = vpop.f32.mrb[7].mxu1 }
 0x420   : >> { %v1319_v52 = vpop.f32.mrb[0].mxu0  ;;  %v1362_v53 = vpop.f32.mrb[8].mxu1 }
 0x421   : >> { %v1371_v24 = vadd.f32 %v1362_v53, %v1213_v34  ;;  %v1385_v25 = vadd.f32 %v1378_v11, %v1319_v52  ;;  %v1321_v0 = vpop.f32.mrb[1].mxu0  ;;  %v2607_v55 = vpop.f32.mrb[9].mxu1 }
 0x422   : >> { %v1386_v26 = vadd.f32 %v1378_v11, %v1321_v0  ;;  %v1323_v27 = vpop.f32.mrb[2].mxu0  ;;  %v1365_v56 = vpop.f32.mrb[10].mxu1 }
 0x423   : >> { %v1387_v57 = vadd.f32 %v1378_v11, %v1371_v24  ;;  %v1388_v30 = vadd.f32 %v1383_v50, %v1323_v27  ;;  %v1391_v35 = vmax.f32 %v1385_v25, 0.0  ;;  %v1374_v36 = vadd.f32 %v1365_v56, %v1216_v44  ;;  %v1325_v37 = vpop.f32.mrb[3].mxu0  ;;  %v2608_v39 = vpop.f32.mrb[11].mxu1 }
 0x424   : >> { %v1392_v40 = vmax.f32 %v1386_v26, 0.0  ;;  %v1389_v38 = vadd.f32 %v1383_v50, %v1325_v37 }
 0x425   : >> { %v1393_v60 = vmax.f32 %v1387_v57, 0.0  ;;  %v1394_v62 = vmax.f32 %v1388_v30, 0.0  ;;  %v1390_v63 = vadd.f32 %v1383_v50, %v1374_v36  ;;  %v1397_v42 = vsel %vm3210_vm5, %v1391_v35, 0.0 }
 0x426   : >> { %v1395_v46 = vmax.f32 %v1389_v38, 0.0  ;;  %v1398_v1 = vsel %vm3214_vm7, %v1392_v40, 0.0 }
 0x427   : >> { %v1400_v48 = vsel %vm3210_vm5, %v1394_v62, 0.0  ;;  %v1396_v54 = vmax.f32 %v1390_v63, 0.0  ;;  %v1399_v2 = vsel %vm3218_vm0, %v1393_v60, 0.0  ;;  %v2774_v60 = vld [vmem:[%s3426_s17 + $0x4] ss:$8 sps:$4 sm:$0xff]  }
 0x428   : >> { %v1403_v47 = vpack.c.bf16 %v1400_v48, %v1397_v42  ;;  %v1401_v51 = vsel %vm3214_vm7, %v1395_v46, 0.0  ;;  %v1415_v62 = vld [vmem:[%s1413_s18 + $0x8] sm:$0xff]  ;;  %v1414_v63 = vld [vmem:[%s1413_s18] sm:$0xff] }
 0x429   : >> { %v1402_v3 = vsel %vm3218_vm0, %v1396_v54, 0.0  ;;  %v1404_v4 = vpack.c.bf16 %v1401_v51, %v1398_v1 }
 0x42a   : >> { %v1405_v6 = vpack.c.bf16 %v1402_v3, %v1399_v2  ;;  %1437 = vrot.lane.b32.xlu0 %v1403_v47, %s2805_s10  ;;  %1426 = vrot.lane.b32.xlu1 %v1403_v47, %s2806_s11 }
 0x42e   : >> { %1430 = vrot.lane.b32.xlu0 %v1405_v6, %s2806_s11  ;;  %1454 = vrot.lane.b32.xlu1 %v1403_v47, %s2805_s10 }
 0x432   : >> { %1456 = vrot.lane.b32.xlu0 %v1404_v4, %s2805_s10  ;;  %1428 = vrot.lane.b32.xlu1 %v1404_v4, %s2806_s11 }
 0x436   : >> { %1474 = vrot.lane.b32.xlu0 %v1403_v47, %s2807_s19  ;;  %1458 = vrot.lane.b32.xlu1 %v1405_v6, %s2805_s10 }
 0x43a   : >> { %1603 = vrot.lane.b32.xlu0 %v1403_v47, %s2808_s21  ;;  %1730 = vrot.lane.b32.xlu1 %v1403_v47, %s2806_s11 }
 0x43e   : >> { %1441 = vrot.lane.b32.xlu0 %v1405_v6, %s2805_s10  ;;  %1472 = vrot.lane.b32.xlu1 %v3241_v14, %s2807_s19 }
 0x442   : >> { %1601 = vrot.lane.b32.xlu0 %v3241_v14, %s2808_s21  ;;  %1439 = vrot.lane.b32.xlu1 %v1404_v4, %s2805_s10  ;;  %v1461_v14 = vpop.permute.xlu0 %1460 }
 0x446   : >> { %1732 = vrot.lane.b32.xlu0 %v1404_v4, %s2806_s11  ;;  %1470 = vrot.lane.b32.xlu1 %v3457_v8, %s2809_s22  ;;  %v1737_v9 = vpop.permute.xlu0 %1736 }
 0x44a   : >> { %1749 = vrot.lane.b32.xlu0 %v1403_v47, %s2811_s24  ;;  %1734 = vrot.lane.b32.xlu1 %v1405_v6, %s2806_s11 }
 0x44e   : >> { %1478 = vrot.lane.b32.xlu0 %v1405_v6, %s2807_s19  ;;  %1755 = vrot.lane.b32.xlu1 %v3239_v13, %s2811_s24 }
 0x452   : >> { %1607 = vrot.lane.b32.xlu0 %v1405_v6, %s2808_s21  ;;  %1476 = vrot.lane.b32.xlu1 %v1404_v4, %s2807_s19 }
 0x456   : >> { %1753 = vrot.lane.b32.xlu0 %v1405_v6, %s2811_s24  ;;  %1605 = vrot.lane.b32.xlu1 %v1404_v4, %s2808_s21 }
 0x45a   : >> { %1751 = vrot.lane.b32.xlu1 %v1404_v4, %s2811_s24 }
 0x49c   : >> { %v1438_v32 = vpop.permute.xlu0 %1437  ;;  %v1427_v15 = vpop.permute.xlu1 %1426 }
 0x49d   : >> { %1480 = vrot.lane.b32.xlu1 %v1427_v15, %s2807_s19  ;;  %v1432_v21 = vsel %vm435_vm1, %v1425_v7, %v1427_v15  ;;  %v1443_v23 = vsel %vm3804_vm11, %v1436_v12, %v1438_v32  ;;  %vm3808_vm11 = vmmov %vm3801_vm2 }
 0x4a0   : >> { %v1431_v17 = vpop.permute.xlu0 %1430  ;;  %v1455_v13 = vpop.permute.xlu1 %1454 }
 0x4a1   : >> { %1486 = vrot.lane.b32.xlu0 %v1431_v17, %s2807_s19  ;;  %1488 = vrot.lane.b32.xlu1 %v1455_v13, %s2807_s19 }
 0x4a4   : >> { %v1457_v19 = vpop.permute.xlu0 %1456  ;;  %v1429_v20 = vpop.permute.xlu1 %1428 }
 0x4a5   : >> { %1609 = vrot.lane.b32.xlu0 %v1432_v21, %s2808_s21  ;;  %1615 = vrot.lane.b32.xlu1 %v1431_v17, %s2808_s21  ;;  %v1433_v31 = vsel %vm435_vm1, %v1427_v15, %v1429_v20  ;;  %v1462_v43 = vsel %vm3805_vm15, %v1455_v13, %v1457_v19  ;;  %v1434_v11 = vsel %vm435_vm1, %v1429_v20, %v1431_v17 }
 0x4a8   : >> { %v1475_v16 = vpop.permute.xlu0 %1474  ;;  %v1459_v22 = vpop.permute.xlu1 %1458 }
 0x4a9   : >> { %1617 = vrot.lane.b32.xlu0 %v1443_v23, %s2808_s21  ;;  %v1464_v50 = vsel %vm3801_vm2, %v1459_v22, %v1461_v14  ;;  %v1463_v25 = vsel %vm3806_vm14, %v1457_v19, %v1459_v22 }
 0x4ac   : >> { %v3480_v28 = vpop.permute.xlu0 %1603  ;;  %v1731_v29 = vpop.permute.xlu1 %1730 }
 0x4ad   : >> { %1482 = vrot.lane.b32.xlu0 %v1433_v31, %s2807_s19 }
 0x4b0   : >> { %v1442_v34 = vpop.permute.xlu0 %1441  ;;  %v1473_v41 = vpop.permute.xlu1 %1472 }
 0x4b1   : >> { %1623 = vrot.lane.b32.xlu1 %v1442_v34, %s2808_s21  ;;  %1490 = vrot.lane.b32.xlu0 %v1462_v43, %s2807_s19  ;;  %v1496_v40 = vsel %vm983_vm3, %v1473_v41, %v1475_v16 }
 0x4b4   : >> { %v1602_v44 = vpop.permute.xlu0 %1601  ;;  %v1440_v49 = vpop.permute.xlu1 %1439 }
 0x4b5   : >> { %v3491_v52 = vsel %vm742_vm6, %v1602_v44, %v3480_v28  ;;  %1484 = vrot.lane.b32.xlu1 %v1434_v11, %s2807_s19  ;;  %1494 = vrot.lane.b32.xlu0 %v1464_v50, %s2807_s19  ;;  %v1445_v0 = vsel %vm3807_vm12, %v1440_v49, %v1442_v34  ;;  %v1444_v57 = vsel %vm3808_vm11, %v1438_v32, %v1440_v49 }
 0x4b8   : >> { %v1733_v53 = vpop.permute.xlu0 %1732  ;;  %v3495_v24 = vpop.permute.xlu1 %1470 }
 0x4b9   : >> { %1613 = vrot.lane.b32.xlu0 %v1434_v11, %s2808_s21  ;;  %1492 = vrot.lane.b32.xlu1 %v1463_v25, %s2807_s19  ;;  %v1738_v30 = vsel %vm435_vm1, %v1731_v29, %v1733_v53 }
 0x4bc   : >> { %v1735_v55 = vpop.permute.xlu1 %1734  ;;  %v3503_v26 = vpop.permute.xlu0 %1749 }
 0x4bd   : >> { %1763 = vrot.lane.b32.xlu1 %v1737_v9, %s2811_s24  ;;  %1621 = vrot.lane.b32.xlu0 %v1445_v0, %s2808_s21  ;;  %v1740_v27 = vsel %vm435_vm1, %v1735_v55, %v1737_v9  ;;  %v1739_v38 = vsel %vm435_vm1, %v1733_v53, %v1735_v55 }
 0x4c0   : >> { %v3506_v56 = vpop.permute.xlu1 %1755  ;;  %v1479_v35 = vpop.permute.xlu0 %1478 }
 0x4c1   : >> { %1611 = vrot.lane.b32.xlu1 %v1433_v31, %s2808_s21  ;;  %1761 = vrot.lane.b32.xlu0 %v1740_v27, %s2811_s24 }
 0x4c4   : >> { %v1477_v36 = vpop.permute.xlu1 %1476  ;;  %v1608_v46 = vpop.permute.xlu0 %1607 }
 0x4c5   : >> { %v1498_v37 = vsel %vm983_vm3, %v1477_v36, %v1479_v35  ;;  %1619 = vrot.lane.b32.xlu1 %v1444_v57, %s2808_s21  ;;  %1757 = vrot.lane.b32.xlu0 %v1738_v30, %s2811_s24  ;;  %v1497_v39 = vsel %vm983_vm3, %v1475_v16, %v1477_v36 }
 0x4c6   : >> { %1517 = vmatprep.subr.bf16.mxu0 %v1497_v39  ;;  %2610 = vmatpush3.bf16.msra.mxu1 %v1498_v37 }
 0x4c7   : >> { %1518 = vmatpush1.bf16.msra.mxu0 %v1496_v40  ;;  %2611 = vmatprep.subr.bf16.mxu1 %v2810_v33 }
 0x4c8   : >> { %v1606_v42 = vpop.permute.xlu1 %1605  ;;  %v3532_v48 = vpop.permute.xlu0 %1753 }
 0x4c9   : >> { %1771 = vrot.lane.b32.xlu1 %v1461_v14, %s2811_s24  ;;  %1769 = vrot.lane.b32.xlu0 %v1464_v50, %s2811_s24  ;;  %v1626_v22 = vsel %vm742_vm6, %v3480_v28, %v1606_v42  ;;  %v1627_v31 = vsel %vm742_vm6, %v1606_v42, %v1608_v46  ;;  %v1775_v55 = vsel %vm1263_vm10, %v3532_v48, %v3506_v56 }
 0x4cc   : >> { %v3534_v54 = vpop.permute.xlu1 %1751 }
 0x4cd   : >> { %1765 = vrot.lane.b32.xlu0 %v1462_v43, %s2811_s24  ;;  %1759 = vrot.lane.b32.xlu1 %v1739_v38, %s2811_s24  ;;  %v1773_v27 = vsel %vm1263_vm10, %v3503_v26, %v3534_v54 }
 0x4d1   : >> { %1746 = vrot.lane.b32.xlu0 %v2774_v60, %s2814_s25  ;;  %1767 = vrot.lane.b32.xlu1 %v1463_v25, %s2811_s24 }
 0x4d5   : >> { %1891 = vperm.xlu0 %2768, %v1415_v62   ;;  %1744 = vrot.lane.b32.xlu1 %v3457_v8, %s2814_s25 }
 0x4d9   : >> { %1886 = vperm.xlu1 %2767, %v1414_v63  }
 0x50f   : >> { %v1481_v1 = vpop.permute.xlu1 %1480 }
 0x513   : >> { %v1487_v47 = vpop.permute.xlu0 %1486  ;;  %v1489_v2 = vpop.permute.xlu1 %1488 }
 0x517   : >> { %v1610_v51 = vpop.permute.xlu0 %1609  ;;  %v1616_v4 = vpop.permute.xlu1 %1615 }
 0x51b   : >> { %v1618_v3 = vpop.permute.xlu0 %1617 }
 0x51f   : >> { %v1483_v6 = vpop.permute.xlu0 %1482 }
 0x520   : >> { %v1499_v17 = vsel %vm983_vm3, %v1481_v1, %v1483_v6 }
 0x523   : >> { %v1491_v14 = vpop.permute.xlu0 %1490  ;;  %v1624_v7 = vpop.permute.xlu1 %1623 }
 0x524   : >> { %v1502_v16 = vsel %vm983_vm3, %v1489_v2, %v1491_v14 }
 0x527   : >> { %v1495_v9 = vpop.permute.xlu0 %1494  ;;  %v1485_v12 = vpop.permute.xlu1 %1484 }
 0x528   : >> { %v1501_v32 = vsel %vm983_vm3, %v1485_v12, %v1487_v47  ;;  %v1500_v15 = vsel %vm983_vm3, %v1483_v6, %v1485_v12 }
 0x529   : >> { %1519 = vmatprep.subr.bf16.mxu0 %v1500_v15  ;;  %2612 = vmatpush3.bf16.msra.mxu1 %v1501_v32  ;;  %v1901_v15 = vld [vmem:[#allocation2 + $0x8] sm:$0xff] }
 0x52a   : >> { %1520 = vmatpush1.bf16.msra.mxu0 %v1499_v17  ;;  %2613 = vmatprep.subr.bf16.mxu1 %v2810_v33 }
 0x52b   : >> { %v1614_v13 = vpop.permute.xlu0 %1613  ;;  %v1493_v19 = vpop.permute.xlu1 %1492 }
 0x52c   : >> { %v1504_v20 = vsel %vm983_vm3, %v1493_v19, %v1495_v9  ;;  %v1503_v21 = vsel %vm983_vm3, %v1491_v14, %v1493_v19  ;;  %v1630_v41 = vsel %vm742_vm6, %v1614_v13, %v1616_v4  ;;  %v1900_v14 = vld [vmem:[#allocation2] sm:$0xff] }
 0x52d   : >> { %1521 = vmatprep.subr.bf16.mxu0 %v1503_v21  ;;  %2614 = vmatpush3.bf16.msra.mxu1 %v1504_v20  ;;  %v1902_v21 = vld [vmem:[#allocation2 + $0x10] sm:$0xff] }
 0x52e   : >> { %1522 = vmatpush1.bf16.msra.mxu0 %v1502_v16  ;;  %2619 = vmatprep.subr.bf16.mxu1 %v2810_v33 }
 0x52f   : >> { %v1622_v23 = vpop.permute.xlu0 %1621  ;;  %1646 = vmatprep.subr.bf16.mxu0 %v1626_v22  ;;  %v1764_v29 = vpop.permute.xlu1 %1763  ;;  %v1903_v22 = vld [vmem:[#allocation2 + $0x18] sm:$0xff] }
 0x530   : >> { %2616 = vmatmul.mubr.msk.bf16.vlgmr.msra.gmra.mrb[12].mxu1 %vm1002_vm8, %v3495_v24  ;;  %v1633_v50 = vsel %vm742_vm6, %v1622_v23, %v1624_v7 }
 0x531   : >> { %2515 = vmatmul.mubr.msk.bf16.vlgmr.msra.gmra.mrb[4].mxu0 %vm1002_vm8, %v3495_v24  ;;  %2620 = vmatpush3.bf16.msra.mxu1 %v1627_v31  ;;  %v1774_v24 = vsel %vm1263_vm10, %v3534_v54, %v3532_v48 }
 0x532   : >> { %1647 = vmatpush1.bf16.msra.mxu0 %v3491_v52  ;;  %2621 = vmatprep.subr.bf16.mxu1 %v2810_v33 }
 0x533   : >> { %v1762_v34 = vpop.permute.xlu0 %1761  ;;  %v1612_v28 = vpop.permute.xlu1 %1611  ;;  %2625 = vmatprep.mubr.msk.bf16.mxu1 %vm2812_vm13, %v2810_v33  ;;  %1678 = vmatprep.mubr.bf16.mxu0 %v2813_v58 }
 0x534   : >> { %v1628_v43 = vsel %vm742_vm6, %v1610_v51, %v1612_v28  ;;  %v1629_v44 = vsel %vm742_vm6, %v1612_v28, %v1614_v13  ;;  %v1778_v56 = vsel %vm1263_vm10, %v1762_v34, %v1764_v29 }
 0x535   : >> { %1648 = vmatprep.subr.bf16.mxu0 %v1629_v44  ;;  %2622 = vmatpush3.bf16.msra.mxu1 %v1630_v41 }
 0x536   : >> { %1649 = vmatpush1.bf16.msra.mxu0 %v1628_v43  ;;  %2623 = vmatprep.subr.bf16.mxu1 %v2810_v33  ;;  %v1904_v43 = vld [vmem:[#allocation2 + $0x20] sm:$0xff] }
 0x537   : >> { %v1758_v49 = vpop.permute.xlu0 %1757  ;;  %v1620_v11 = vpop.permute.xlu1 %1619 }
 0x538   : >> { %v1631_v52 = vsel %vm742_vm6, %v1618_v3, %v1620_v11  ;;  %v1632_v53 = vsel %vm742_vm6, %v1620_v11, %v1622_v23 }
 0x539   : >> { %1650 = vmatprep.subr.bf16.mxu0 %v1632_v53  ;;  %2624 = vmatpush3.bf16.msra.mxu1 %v1633_v50 }
 0x53a   : >> { %1651 = vmatpush1.bf16.msra.mxu0 %v1631_v52  ;;  %2629 = vmatprep.subr.bf16.mxu1 %v2810_v33  ;;  %v1905_v52 = vld [vmem:[#allocation2 + $0x28] sm:$0xff] }
 0x53b   : >> { %v1770_v25 = vpop.permute.xlu0 %1769  ;;  %1794 = vmatprep.subr.bf16.mxu0 %v1774_v24  ;;  %v1772_v0 = vpop.permute.xlu1 %1771 }
 0x53c   : >> { %2626 = vmatmul.mubr.msk.bf16.vlgmr.msra.gmra.mrb[16].mxu1 %vm1002_vm8, %v3457_v8  ;;  %v1781_v36 = vsel %vm1263_vm10, %v1770_v25, %v1772_v0 }
 0x53d   : >> { %2517 = vmatmul.mubr.msk.bf16.vlgmr.msra.gmra.mrb[4].mxu0 %vm1002_vm8, %v3457_v8  ;;  %2630 = vmatpush3.bf16.msra.mxu1 %v1775_v55 }
 0x53e   : >> { %1795 = vmatpush1.bf16.msra.mxu0 %v1773_v27  ;;  %2631 = vmatprep.subr.bf16.mxu1 %v2810_v33 }
 0x53f   : >> { %v1760_v57 = vpop.permute.xlu1 %1759  ;;  %1826 = vmatprep.mubr.bf16.mxu0 %v2813_v58  ;;  %2635 = vmatprep.mubr.msk.bf16.mxu1 %vm2812_vm13, %v2810_v33  ;;  %v1766_v26 = vpop.permute.xlu0 %1765 }
 0x540   : >> { %v1776_v30 = vsel %vm1263_vm10, %v1758_v49, %v1760_v57  ;;  %v1777_v35 = vsel %vm1263_vm10, %v1760_v57, %v1762_v34 }
 0x541   : >> { %1796 = vmatprep.subr.bf16.mxu0 %v1777_v35  ;;  %2632 = vmatpush3.bf16.msra.mxu1 %v1778_v56 }
 0x542   : >> { %1797 = vmatpush1.bf16.msra.mxu0 %v1776_v30  ;;  %2633 = vmatprep.subr.bf16.mxu1 %v2810_v33 }
 0x543   : >> { %v1768_v8 = vpop.permute.xlu1 %1767  ;;  %v1747_v39 = vpop.permute.xlu0 %1746 }
 0x544   : >> { %v1779_v58 = vsel %vm1263_vm10, %v1766_v26, %v1768_v8  ;;  %v1780_v37 = vsel %vm1263_vm10, %v1768_v8, %v1770_v25 }
 0x545   : >> { %1798 = vmatprep.subr.bf16.mxu0 %v1780_v37  ;;  %2634 = vmatpush3.bf16.msra.mxu1 %v1781_v36 }
 0x546   : >> { %1799 = vmatpush1.bf16.msra.mxu0 %v1779_v58  ;;  %2639 = vmatprep.subr.bf16.mxu1 (%p872_p4), %v2800_v18 }
 0x547   : >> { %v1745_v40 = vpop.permute.xlu1 %1744 }
 0x548   : >> { %v1748_v38 = vsel %vm1237_vm9, %v1745_v40, %v1747_v39  ;;  %v3643_v39 = vrot.slane (%p872_p4), %v3637_v61, %v2872_v5 }
 0x549   : >> { %2520 = vmatmul.mubr.msk.bf16.vlgmr.msra.gmra.mrb[4].mxu0 %vm1002_vm8, %v1748_v38  ;;  %2636 = vmatmul.mubr.msk.bf16.vlgmr.msra.gmra.mrb[20].mxu1 %vm1002_vm8, %v1748_v38 }
 0x54a   : > { %2645 = vmatprep.mubr.msk.bf16.mxu1 (%p872_p4), %vm2803_vm4, %v2800_v18  ;;  %2075 = vmatprep.mubr.bf16.mxu0 (%p872_p4), %v2802_v59 }
 0x554   : >> { %v1892_v51 = vpop.permute.xlu0 %1891 }
 0x558   : >> { %v1887_v2 = vpop.permute.xlu1 %1886 }
 0x603   : >> { %v1594_v60 = vpop.f32.mrb[12].mxu1 }
 0x604   : >> { %v2617_v33 = vpop.f32.mrb[13].mxu1 }
 0x605   : >> { %v1597_v62 = vpop.f32.mrb[14].mxu1 }
 0x606   : >> { %v2618_v63 = vpop.f32.mrb[15].mxu1 }
 0x60f   : >> { %v1723_v46 = vpop.f32.mrb[16].mxu1 }
 0x610   : >> { %v1724_v42 = vadd.f32 %v1723_v46, %v1594_v60  ;;  %v2627_v48 = vpop.f32.mrb[17].mxu1 }
 0x611   : >> { %v1726_v54 = vpop.f32.mrb[18].mxu1 }
 0x612   : >> { %v1727_v1 = vadd.f32 %v1726_v54, %v1597_v62  ;;  %v2628_v47 = vpop.f32.mrb[19].mxu1 }
 0x61c   : >> { %v1828_v3 = vpop.f32.mrb[4].mxu0  ;;  %v1871_v4 = vpop.f32.mrb[20].mxu1 }
 0x61d   : >> { %v1894_v6 = vadd.f32 %v1887_v2, %v1828_v3  ;;  %v1880_v7 = vadd.f32 %v1871_v4, %v1724_v42  ;;  %v1830_v9 = vpop.f32.mrb[5].mxu0  ;;  %v2637_v12 = vpop.f32.mrb[21].mxu1 }
 0x61e   : >> { %v1895_v32 = vadd.f32 %v1887_v2, %v1830_v9  ;;  %v1832_v17 = vpop.f32.mrb[6].mxu0  ;;  %v1874_v13 = vpop.f32.mrb[22].mxu1 }
 0x61f   : >> { %v1906_v19 = vsel %vm3210_vm5, %v1894_v6, 0.0  ;;  %v1896_v20 = vadd.f32 %v1887_v2, %v1880_v7  ;;  %v1897_v16 = vadd.f32 %v1892_v51, %v1832_v17  ;;  %v1883_v23 = vadd.f32 %v1874_v13, %v1727_v1  ;;  %v1834_v29 = vpop.f32.mrb[7].mxu0  ;;  %v2638_v31 = vpop.f32.mrb[23].mxu1 }
 0x620   : >> { %v1912_v34 = vadd.f32 %v1906_v19, %v1900_v14  ;;  %v1907_v28 = vsel %vm3214_vm7, %v1895_v32, 0.0  ;;  %v1898_v41 = vadd.f32 %v1892_v51, %v1834_v29  ;;  %874 = sbr.rel (!%p872_p4) target bundleno = 552 (0x228), region = 93 }
 0x621   : >> { %v1908_v44 = vsel %vm3218_vm0, %v1896_v20, 0.0  ;;  %v1913_v49 = vadd.f32 %v1907_v28, %v1901_v15  ;;  %v1909_v11 = vsel %vm3210_vm5, %v1897_v16, 0.0  ;;  %v1899_v50 = vadd.f32 %v1892_v51, %v1883_v23 }
 0x622   : >> { %1918 = vst [vmem:[#allocation2] sm:$0xff] %v1912_v34  ;;  %v1914_v53 = vadd.f32 %v1908_v44, %v1902_v21  ;;  %v1915_v24 = vadd.f32 %v1909_v11, %v1903_v22  ;;  %v1910_v25 = vsel %vm3214_vm7, %v1898_v41, 0.0  ;;  %vm3809_vm5 = vcmask (%p872_p4), 1031168  }
 0x623   : >> { %1919 = vst [vmem:[#allocation2 + $0x8] sm:$0xff] %v1913_v49  ;;  %v1911_v0 = vsel %vm3218_vm0, %v1899_v50, 0.0  ;;  %v1916_v55 = vadd.f32 %v1910_v25, %v1904_v43  ;;  %vm3810_vm7 = vmmov (%p872_p4), %vm3809_vm5 }
 0x624   : >> { %1920 = vst [vmem:[#allocation2 + $0x10] sm:$0xff] %v1914_v53  ;;  %1921 = vst [vmem:[#allocation2 + $0x18] sm:$0xff] %v1915_v24  ;;  %v1917_v27 = vadd.f32 %v1911_v0, %v1905_v52  ;;  %v2280_v52 = vcombine.high (%p872_p4), %v3643_v39, %v3643_v39 }
 0x625   : >> { %1922 = vst [vmem:[#allocation2 + $0x20] sm:$0xff] %v1916_v55  ;;  %vm3811_vm0 = vmmov (%p872_p4), %vm3809_vm5 }
 0x626   : >> { %1923 = vst [vmem:[#allocation2 + $0x28] sm:$0xff] %v1917_v27  ;;  %vm3812_vm13 = vmmov (%p872_p4), %vm3811_vm0 }
 0x627   : > { %vm3813_vm15 = vmmov %vm3811_vm0 }
 0x628   : > { %vm3814_vm2 = vmmov %vm3811_vm0 }
 0x629   : > { %v1924_v30 = vld [vmem:[#allocation2] sm:$0xff]  ;;  %vm3815_vm14 = vmmov %vm3811_vm0 }
 0x62a   : > { %v1925_v8 = vld [vmem:[#allocation2 + $0x8] sm:$0xff]  ;;  %vm3816_vm12 = vmmov %vm3811_vm0 }
 0x62b   : > { %v1926_v57 = vld [vmem:[#allocation2 + $0x10] sm:$0xff]  ;;  %v1927_v26 = vld [vmem:[#allocation2 + $0x18] sm:$0xff]  ;;  %vm3817_vm11 = vmmov %vm3811_vm0 }
 0x62c   : > { %v1928_v36 = vld [vmem:[#allocation2 + $0x20] sm:$0xff]  ;;  %v1930_v58 = vpack.c.bf16 %v1927_v26, %v1924_v30 }
 0x62d   : > { %v1929_v56 = vld [vmem:[#allocation2 + $0x28] sm:$0xff]  ;;  %v1931_v37 = vpack.c.bf16 %v1928_v36, %v1925_v8 }
 0x62e   : > { %v1932_v35 = vpack.c.bf16 %v1929_v56, %v1926_v57  ;;  %1947 = vrot.lane.b32.xlu0 %v1930_v58, %s2793_s16 }
 0x630   : > { %1951 = vrot.lane.b32.xlu1 %v1932_v35, %s2793_s16 }
 0x632   : > { %1949 = vrot.lane.b32.xlu0 %v1931_v37, %s2793_s16 }
 0x634   : > { %1975 = vrot.lane.b32.xlu1 %v1930_v58, %s2792_s15 }
 0x636   : > { %1977 = vrot.lane.b32.xlu0 %v1931_v37, %s2792_s15 }
 0x638   : > { %1979 = vrot.lane.b32.xlu1 %v1932_v35, %s2792_s15 }
 0x63a   : > { %1981 = vrot.lane.b32.xlu0 %v1970_v10, %s2792_s15 }
 0x63c   : > { %1945 = vrot.lane.b32.xlu1 %v1937_v45, %s2793_s16 }
 0x63e   : > { %1958 = vrot.lane.b32.xlu0 %v1930_v58, %s2792_s15 }
 0x640   : > { %1960 = vrot.lane.b32.xlu1 %v1931_v37, %s2792_s15 }
 0x642   : > { %1962 = vrot.lane.b32.xlu0 %v1932_v35, %s2792_s15 }
 0x644   : > { %1956 = vrot.lane.b32.xlu1 %v1937_v45, %s2792_s15 }
 0x646   : > { %2260 = vrot.lane.b32.xlu0 %v1931_v37, %s2793_s16 }
 0x648   : > { %2262 = vrot.lane.b32.xlu1 %v1932_v35, %s2793_s16 }
 0x64a   : > { %2264 = vrot.lane.b32.xlu0 %v1970_v10, %s2793_s16 }
 0x64c   : > { %2258 = vrot.lane.b32.xlu1 %v1930_v58, %s2793_s16  ;;  %s2817_s16 = smov 32  }
 0x64e   : > { %2271 = vrot.lane.b32.xlu0 %v1931_v37, %s2792_s15 }
 0x650   : > { %2273 = vrot.lane.b32.xlu1 %v1932_v35, %s2792_s15 }
 0x652   : > { %2275 = vrot.lane.b32.xlu0 %v1970_v10, %s2792_s15 }
 0x654   : > { %2269 = vrot.lane.b32.xlu1 %v1930_v58, %s2792_s15  ;;  %s2816_s15 = smov 105  }
 0x656   : > { %1998 = vrot.lane.b32.xlu0 %v1930_v58, %s2815_s9 }
 0x658   : > { %2000 = vrot.lane.b32.xlu1 %v1931_v37, %s2815_s9 }
 0x65a   : > { %1996 = vrot.lane.b32.xlu0 %v1937_v45, %s2815_s9 }
 0x65c   : > { %2002 = vrot.lane.b32.xlu1 %v1932_v35, %s2815_s9 }
 0x65e   : > { %2126 = vrot.lane.b32.xlu0 %v1930_v58, %s2801_s23 }
 0x660   : > { %2128 = vrot.lane.b32.xlu1 %v1931_v37, %s2801_s23 }
 0x662   : > { %1994 = vrot.lane.b32.xlu0 %v3643_v39, %s2797_s20 }
 0x664   : > { %2124 = vrot.lane.b32.xlu1 %v1937_v45, %s2801_s23 }
 0x666   : > { %2130 = vrot.lane.b32.xlu0 %v1932_v35, %s2801_s23 }
 0x668   : > { %2289 = vrot.lane.b32.xlu1 %v1931_v37, %s2816_s15 }
 0x66a   : > { %2291 = vrot.lane.b32.xlu0 %v1932_v35, %s2816_s15 }
 0x66c   : > { %2287 = vrot.lane.b32.xlu1 %v1930_v58, %s2816_s15 }
 0x66e   : > { %2293 = vrot.lane.b32.xlu0 %v1970_v10, %s2816_s15 }
 0x6a0   : > { %v1948_v38 = vpop.permute.xlu0 %1947 }
 0x6a1   : > { %2004 = vrot.lane.b32.xlu0 %v1948_v38, %s2815_s9 }
 0x6a2   : > { %v1952_v40 = vpop.permute.xlu1 %1951 }
 0x6a3   : > { %2010 = vrot.lane.b32.xlu1 %v1952_v40, %s2815_s9 }
 0x6a4   : > { %v1950_v60 = vpop.permute.xlu0 %1949 }
 0x6a5   : > { %v1955_v33 = vsel %vm435_vm1, %v1950_v60, %v1952_v40  ;;  %v1954_v51 = vsel %vm435_vm1, %v1948_v38, %v1950_v60 }
 0x6a6   : > { %v1976_v5 = vpop.permute.xlu1 %1975 }
 0x6a7   : > { %2012 = vrot.lane.b32.xlu0 %v1976_v5, %s2815_s9  ;;  %2008 = vrot.lane.b32.xlu1 %v1955_v33, %s2815_s9 }
 0x6a8   : > { %v1978_v63 = vpop.permute.xlu0 %1977 }
 0x6a9   : > { %v1983_v12 = vsel %vm3812_vm13, %v1976_v5, %v1978_v63 }
 0x6aa   : > { %v1980_v62 = vpop.permute.xlu1 %1979 }
 0x6ab   : > { %2138 = vrot.lane.b32.xlu0 %v1952_v40, %s2801_s23  ;;  %v1984_v46 = vsel %vm3809_vm5, %v1978_v63, %v1980_v62 }
 0x6ac   : > { %2016 = vrot.lane.b32.xlu1 %v1984_v46, %s2815_s9  ;;  %v1982_v48 = vpop.permute.xlu0 %1981 }
 0x6ad   : > { %v1985_v54 = vsel %vm3810_vm7, %v1980_v62, %v1982_v48 }
 0x6ae   : > { %v1946_v42 = vpop.permute.xlu1 %1945 }
 0x6af   : > { %v1953_v4 = vsel %vm435_vm1, %v1946_v42, %v1948_v38 }
 0x6b0   : > { %2018 = vrot.lane.b32.xlu1 %v1985_v54, %s2815_s9  ;;  %v1959_v47 = vpop.permute.xlu0 %1958 }
 0x6b2   : > { %v1961_v1 = vpop.permute.xlu1 %1960 }
 0x6b3   : > { %v1965_v7 = vsel %vm3811_vm0, %v1959_v47, %v1961_v1 }
 0x6b4   : > { %2134 = vrot.lane.b32.xlu1 %v1954_v51, %s2801_s23  ;;  %v1963_v3 = vpop.permute.xlu0 %1962 }
 0x6b5   : > { %2146 = vrot.lane.b32.xlu0 %v1963_v3, %s2801_s23  ;;  %v1966_v29 = vsel %vm3815_vm14, %v1961_v1, %v1963_v3 }
 0x6b6   : > { %v1957_v2 = vpop.permute.xlu1 %1956 }
 0x6b7   : > { %v1964_v15 = vsel %vm3813_vm15, %v1957_v2, %v1959_v47 }
 0x6b8   : > { %2132 = vrot.lane.b32.xlu1 %v1953_v4, %s2801_s23  ;;  %v2261_v14 = vpop.permute.xlu0 %2260 }
 0x6b9   : > { %2006 = vrot.lane.b32.xlu0 %v1954_v51, %s2815_s9 }
 0x6ba   : > { %v2263_v6 = vpop.permute.xlu1 %2262 }
 0x6bb   : > { %v2267_v19 = vsel %vm435_vm1, %v2261_v14, %v2263_v6 }
 0x6bc   : > { %2142 = vrot.lane.b32.xlu1 %v1965_v7, %s2801_s23  ;;  %v2265_v32 = vpop.permute.xlu0 %2264 }
 0x6bd   : > { %2014 = vrot.lane.b32.xlu0 %v1983_v12, %s2815_s9  ;;  %v2268_v11 = vsel %vm435_vm1, %v2263_v6, %v2265_v32 }
 0x6be   : > { %v2259_v9 = vpop.permute.xlu1 %2258 }
 0x6bf   : > { %v2266_v16 = vsel %vm435_vm1, %v2259_v9, %v2261_v14 }
 0x6c0   : > { %2140 = vrot.lane.b32.xlu1 %v1964_v15, %s2801_s23  ;;  %v2272_v13 = vpop.permute.xlu0 %2271 }
 0x6c1   : > { %2301 = vrot.lane.b32.xlu0 %v2265_v32, %s2816_s15 }
 0x6c2   : > { %v2274_v17 = vpop.permute.xlu1 %2273 }
 0x6c3   : > { %v2278_v22 = vsel %vm3814_vm2, %v2272_v13, %v2274_v17 }
 0x6c4   : > { %2297 = vrot.lane.b32.xlu1 %v2267_v19, %s2816_s15  ;;  %v2276_v21 = vpop.permute.xlu0 %2275 }
 0x6c5   : > { %2136 = vrot.lane.b32.xlu0 %v1955_v33, %s2801_s23  ;;  %v2279_v50 = vsel %vm3817_vm11, %v2274_v17, %v2276_v21 }
 0x6c6   : > { %v2270_v20 = vpop.permute.xlu1 %2269 }
 0x6c7   : > { %v2277_v44 = vsel %vm3816_vm12, %v2270_v20, %v2272_v13 }
 0x6c8   : > { %2295 = vrot.lane.b32.xlu1 %v2266_v16, %s2816_s15  ;;  %v1999_v31 = vpop.permute.xlu0 %1998 }
 0x6c9   : > { %2144 = vrot.lane.b32.xlu0 %v1966_v29, %s2801_s23 }
 0x6ca   : > { %v2001_v23 = vpop.permute.xlu1 %2000 }
 0x6cb   : > { %v2022_v34 = vsel %vm983_vm3, %v1999_v31, %v2001_v23 }
 0x6cc   : > { %2305 = vrot.lane.b32.xlu1 %v2278_v22, %s2816_s15  ;;  %2043 = vmatprep.subr.bf16.mxu0 %v2022_v34  ;;  %v1997_v41 = vpop.permute.xlu0 %1996 }
 0x6cd   : > { %2309 = vrot.lane.b32.xlu0 %v2276_v21, %s2816_s15  ;;  %v2021_v49 = vsel %vm983_vm3, %v1997_v41, %v1999_v31 }
 0x6ce   : > { %v2003_v28 = vpop.permute.xlu1 %2002  ;;  %2044 = vmatpush1.bf16.msra.mxu0 %v2021_v49 }
 0x6cf   : > { %v2023_v43 = vsel %vm983_vm3, %v2001_v23, %v2003_v28 }
 0x6d0   : > { %2640 = vmatpush3.bf16.msra.mxu1 %v2023_v43  ;;  %2303 = vrot.lane.b32.xlu1 %v2277_v44, %s2816_s15  ;;  %v2127_v53 = vpop.permute.xlu0 %2126 }
 0x6d1   : > { %2641 = vmatprep.subr.bf16.mxu1 %v2800_v18  ;;  %2299 = vrot.lane.b32.xlu0 %v2268_v11, %s2816_s15 }
 0x6d2   : > { %v2129_v24 = vpop.permute.xlu1 %2128 }
 0x6d3   : > { %v2149_v47 = vsel %vm742_vm6, %v2127_v53, %v2129_v24 }
 0x6d4   : > { %2281 = vrot.lane.b32.xlu1 %v3643_v39, %s2817_s16  ;;  %v1995_v25 = vpop.permute.xlu0 %1994 }
 0x6d5   : > { %2307 = vrot.lane.b32.xlu0 %v2279_v50, %s2816_s15 }
 0x6d6   : > { %v2125_v0 = vpop.permute.xlu1 %2124 }
 0x6d7   : > { %v2148_v3 = vsel %vm742_vm6, %v2125_v0, %v2127_v53 }
 0x6d8   : > { %v2131_v55 = vpop.permute.xlu0 %2130 }
 0x6d9   : > { %2283 = vrot.lane.b32.xlu0 %v2280_v52, %s2817_s16  ;;  %v2150_v38 = vsel %vm742_vm6, %v2129_v24, %v2131_v55 }
 0x6da   : > { %v3699_v27 = vpop.permute.xlu1 %2289 }
 0x6dc   : > { %v3701_v57 = vpop.permute.xlu0 %2291 }
 0x6dd   : > { %v2313_v13 = vsel %vm1263_vm10, %v3699_v27, %v3701_v57 }
 0x6de   : > { %v3703_v56 = vpop.permute.xlu1 %2287 }
 0x6df   : > { %v2312_v16 = vsel %vm1263_vm10, %v3703_v56, %v3699_v27 }
 0x6e0   : > { %v3705_v30 = vpop.permute.xlu0 %2293 }
 0x6e1   : > { %v2314_v21 = vsel %vm1263_vm10, %v3701_v57, %v3705_v30 }
 0x713   : > { %v2005_v26 = vpop.permute.xlu0 %2004 }
 0x715   : > { %v2011_v35 = vpop.permute.xlu1 %2010 }
 0x719   : > { %v2009_v8 = vpop.permute.xlu1 %2008  ;;  %v2013_v37 = vpop.permute.xlu0 %2012 }
 0x71a   : > { %v2026_v36 = vsel %vm983_vm3, %v2009_v8, %v2011_v35 }
 0x71b   : > { %2642 = vmatpush3.bf16.msra.mxu1 %v2026_v36 }
 0x71c   : > { %2643 = vmatprep.subr.bf16.mxu1 %v2800_v18 }
 0x71d   : > { %v2139_v39 = vpop.permute.xlu0 %2138 }
 0x71e   : > { %v2017_v58 = vpop.permute.xlu1 %2016 }
 0x722   : > { %v2019_v45 = vpop.permute.xlu1 %2018 }
 0x723   : > { %v2029_v10 = vsel %vm983_vm3, %v2017_v58, %v2019_v45 }
 0x724   : > { %2644 = vmatpush3.bf16.msra.mxu1 %v2029_v10 }
 0x725   : > { %2649 = vmatprep.subr.bf16.mxu1 %v2800_v18 }
 0x726   : > { %v2135_v40 = vpop.permute.xlu1 %2134 }
 0x727   : > { %2646 = vmatmul.mubr.msk.bf16.vlgmr.msra.gmra.mrb[0].mxu1 %vm1002_vm8, %v1995_v25  ;;  %v2147_v5 = vpop.permute.xlu0 %2146 }
 0x728   : > { %2650 = vmatpush3.bf16.msra.mxu1 %v2150_v38  ;;  %2655 = vmatprep.mubr.msk.bf16.mxu1 %vm2803_vm4, %v2800_v18 }
 0x729   : > { %2651 = vmatprep.subr.bf16.mxu1 %v2800_v18 }
 0x72a   : > { %v2133_v60 = vpop.permute.xlu1 %2132 }
 0x72b   : > { %v2007_v33 = vpop.permute.xlu0 %2006  ;;  %v2151_v7 = vsel %vm742_vm6, %v2133_v60, %v2135_v40 }
 0x72c   : > { %v2025_v63 = vsel %vm983_vm3, %v2007_v33, %v2009_v8  ;;  %v2024_v46 = vsel %vm983_vm3, %v2005_v26, %v2007_v33 }
 0x72d   : > { %2045 = vmatprep.subr.bf16.mxu0 %v2025_v63 }
 0x72e   : > { %v2143_v62 = vpop.permute.xlu1 %2142  ;;  %2046 = vmatpush1.bf16.msra.mxu0 %v2024_v46 }
 0x72f   : > { %v2015_v42 = vpop.permute.xlu0 %2014 }
 0x730   : > { %v2028_v54 = vsel %vm983_vm3, %v2015_v42, %v2017_v58  ;;  %v2027_v1 = vsel %vm983_vm3, %v2013_v37, %v2015_v42 }
 0x731   : > { %2047 = vmatprep.subr.bf16.mxu0 %v2028_v54 }
 0x732   : > { %v2141_v48 = vpop.permute.xlu1 %2140  ;;  %2048 = vmatpush1.bf16.msra.mxu0 %v2027_v1 }
 0x733   : > { %2169 = vmatprep.subr.bf16.mxu0 %v2149_v47  ;;  %v2302_v51 = vpop.permute.xlu0 %2301  ;;  %v2154_v17 = vsel %vm742_vm6, %v2141_v48, %v2143_v62 }
 0x735   : > { %2522 = vmatmul.mubr.msk.bf16.vlgmr.msra.gmra.mrb[0].mxu0 %vm1002_vm8, %v1995_v25 }
 0x736   : > { %v2298_v2 = vpop.permute.xlu1 %2297  ;;  %2170 = vmatpush1.bf16.msra.mxu0 %v2148_v3  ;;  %2201 = vmatprep.mubr.bf16.mxu0 %v2802_v59 }
 0x737   : > { %v2137_v4 = vpop.permute.xlu0 %2136 }
 0x738   : > { %v2153_v6 = vsel %vm742_vm6, %v2137_v4, %v2139_v39  ;;  %v2152_v14 = vsel %vm742_vm6, %v2135_v40, %v2137_v4 }
 0x739   : > { %2171 = vmatprep.subr.bf16.mxu0 %v2152_v14  ;;  %2652 = vmatpush3.bf16.msra.mxu1 %v2153_v6 }
 0x73a   : > { %v2296_v9 = vpop.permute.xlu1 %2295  ;;  %2172 = vmatpush1.bf16.msra.mxu0 %v2151_v7  ;;  %2653 = vmatprep.subr.bf16.mxu1 %v2800_v18 }
 0x73b   : > { %v2145_v12 = vpop.permute.xlu0 %2144  ;;  %v2315_v31 = vsel %vm1263_vm10, %v2296_v9, %v2298_v2 }
 0x73c   : > { %v2156_v32 = vsel %vm742_vm6, %v2145_v12, %v2147_v5  ;;  %v2155_v15 = vsel %vm742_vm6, %v2143_v62, %v2145_v12 }
 0x73d   : > { %2173 = vmatprep.subr.bf16.mxu0 %v2155_v15  ;;  %2654 = vmatpush3.bf16.msra.mxu1 %v2156_v32 }
 0x73e   : > { %2174 = vmatpush1.bf16.msra.mxu0 %v2154_v17  ;;  %2659 = vmatprep.subr.bf16.mxu1 %v2800_v18  ;;  %v2306_v19 = vpop.permute.xlu1 %2305 }
 0x73f   : > { %2333 = vmatprep.subr.bf16.mxu0 %v2313_v13  ;;  %v2310_v20 = vpop.permute.xlu0 %2309 }
 0x740   : > { %2656 = vmatmul.mubr.msk.bf16.vlgmr.msra.gmra.mrb[0].mxu1 %vm1002_vm8, %v3637_v61 }
 0x741   : > { %2524 = vmatmul.mubr.msk.bf16.vlgmr.msra.gmra.mrb[0].mxu0 %vm1002_vm8, %v3637_v61  ;;  %2660 = vmatpush3.bf16.msra.mxu1 %v2314_v21 }
 0x742   : > { %2334 = vmatpush1.bf16.msra.mxu0 %v2312_v16  ;;  %2661 = vmatprep.subr.bf16.mxu1 %v2800_v18  ;;  %v2304_v34 = vpop.permute.xlu1 %2303 }
 0x743   : > { %v2300_v22 = vpop.permute.xlu0 %2299  ;;  %2365 = vmatprep.mubr.bf16.mxu0 %v2802_v59  ;;  %2665 = vmatprep.mubr.msk.bf16.mxu1 %vm2803_vm4, %v2800_v18  ;;  %v2318_v41 = vsel %vm1263_vm10, %v2304_v34, %v2306_v19 }
 0x744   : > { %v2317_v23 = vsel %vm1263_vm10, %v2300_v22, %v2302_v51  ;;  %v2316_v29 = vsel %vm1263_vm10, %v2298_v2, %v2300_v22 }
 0x745   : > { %2335 = vmatprep.subr.bf16.mxu0 %v2316_v29  ;;  %2662 = vmatpush3.bf16.msra.mxu1 %v2317_v23 }
 0x746   : > { %2336 = vmatpush1.bf16.msra.mxu0 %v2315_v31  ;;  %2663 = vmatprep.subr.bf16.mxu1 %v2800_v18  ;;  %v2282_v43 = vpop.permute.xlu1 %2281 }
 0x747   : > { %v2308_v61 = vpop.permute.xlu0 %2307 }
 0x748   : > { %v2320_v28 = vsel %vm1263_vm10, %v2308_v61, %v2310_v20  ;;  %v2319_v59 = vsel %vm1263_vm10, %v2306_v19, %v2308_v61 }
 0x749   : > { %2337 = vmatprep.subr.bf16.mxu0 %v2319_v59  ;;  %2664 = vmatpush3.bf16.msra.mxu1 %v2320_v28 }
 0x74a   : > { %2338 = vmatpush1.bf16.msra.mxu0 %v2318_v41 }
 0x74b   : > { %v2284_v44 = vpop.permute.xlu0 %2283 }
 0x74c   : > { %v2286_v49 = vsel %vm1237_vm9, %v2282_v43, %v2284_v44 }
 0x74d   : > { %2526 = vmatmul.mubr.msk.bf16.vlgmr.msra.gmra.mrb[0].mxu0 %vm1002_vm8, %v2286_v49  ;;  %2666 = vmatmul.mubr.msk.bf16.vlgmr.msra.gmra.mrb[0].mxu1 %vm1002_vm8, %v2286_v49 }
 0x820   : > { %v2367_v18 = vpop.f32.mrb[0].mxu0  ;;  %v2408_v11 = vpop.f32.mrb[0].mxu1 }
 0x821   : > { %2422 = vst [vmem:[%s2882_s14 + $0x8] sm:$0x7] %v2408_v11  ;;  %v2369_v50 = vpop.f32.mrb[1].mxu0  ;;  %v2667_v52 = vpop.f32.mrb[1].mxu1 }
 0x822   : > { %v2419_v53 = vcombine.low %v2367_v18, %v2369_v50  ;;  %v2371_v24 = vpop.f32.mrb[2].mxu0  ;;  %v2411_v25 = vpop.f32.mrb[2].mxu1 }
 0x823   : > { %v2372_v0 = vpop.f32.mrb[3].mxu0  ;;  %v2668_v55 = vpop.f32.mrb[3].mxu1 }
 0x824   : > { %2421 = vst [vmem:[%s2882_s14] sm:$0x77] %v2419_v53 }
 0x825 PF: > { %s18_s27 = sadd.s32 1, %s2785_s27  }
 0x826   : > { %p15_p5 = scmp.ge.s32.totalorder %s18_s27, 4  }
 0x828   :  { %17 = sbr.rel (!%p15_p5) target bundleno = 1 (0x1), region = 104 }

</bundles_post_ra>
